<compile_context>
chip_gen: v6e
topology: v6e:2x2x1
jax: 0.10.0
libtpu: 0.0.40
codegen_flags: <defaults>
</compile_context>

<pallas_src>
import functools

import jax
import jax.numpy as jnp
from jax import lax
from jax.experimental import pallas as pl
from jax.experimental.pallas import tpu as pltpu


def _lstm_fc_kernel(x_ref, wih0_ref, b0_ref, whh0_ref,
                    wih1_ref, whh1_ref, b1_ref, wfc_ref, bfc_ref,
                    out_ref,
                    xp_ref,
                    *, unroll):
    """Whole forward pass for one batch block.

    x_ref:   (T, Bb, I)    input sequence (batch block, padded)
    wih0:    (I, 4H)       layer-0 input weights (transposed)
    b0:      (1, 4H)       layer-0 combined bias (b_ih + b_hh)
    whh0:    (H, 4H)       layer-0 recurrent weights (transposed)
    wih1:    (H, 4H)       layer-1 input weights (transposed)
    whh1:    (H, 4H)       layer-1 recurrent weights (transposed)
    b1:      (1, 4H)       layer-1 combined bias
    wfc:     (H, O), bfc: (1, O)
    out_ref: (Bb, O)
    xp_ref:  (T, Bb, 4H)   VMEM scratch: precomputed layer-0 input projection
    """
    T, Bb, I = x_ref.shape
    H = whh0_ref.shape[0]
    G = 4 * H

    # ---- phase 1: layer-0 input projection for ALL timesteps, one matmul ----
    x_all = x_ref[...].reshape(T * Bb, I)
    xp_ref[...] = (jnp.dot(x_all, wih0_ref[...],
                           preferred_element_type=jnp.float32)
                   + b0_ref[...]).reshape(T, Bb, G)

    # ---- hoist loop-invariant loads / broadcasts out of the recurrence ----
    whh0 = whh0_ref[...]                                   # (H, 4H)
    wih1 = wih1_ref[...]                                   # (H, 4H)
    whh1 = whh1_ref[...]                                   # (H, 4H)
    b1b = jnp.broadcast_to(b1_ref[...], (Bb, G))           # one broadcast only

    zeros = jnp.zeros((Bb, H), jnp.float32)

    def activate(g):
        # Two full-(Bb, 4H)-vreg EUP pushes; lane slicing happens on the
        # activated result, off the front of the serial chain.
        sg = jax.nn.sigmoid(g)
        tg = jnp.tanh(g)
        return (sg[:, 0 * H:1 * H],      # i
                sg[:, 1 * H:2 * H],      # f
                tg[:, 2 * H:3 * H],      # g
                sg[:, 3 * H:4 * H])      # o

    def step(t, carry):
        h0, c0, h1, c1 = carry

        # Both previous-state recurrent matmuls are issued at the top of the
        # step (they depend only on the previous carry); only the
        # h0_new @ W_ih1 matmul below remains on the serial dependency chain.
        r0 = jnp.dot(h0, whh0, preferred_element_type=jnp.float32)
        r1 = jnp.dot(h1, whh1, preferred_element_type=jnp.float32)

        # layer 0
        g0 = xp_ref[t] + r0
        i0, f0, gg0, o0 = activate(g0)
        c0 = f0 * c0 + i0 * gg0
        h0 = o0 * jnp.tanh(c0)

        # layer 1: only this matmul is serialized behind h0_new
        g1 = jnp.dot(h0, wih1, preferred_element_type=jnp.float32) + r1 + b1b
        i1, f1, gg1, o1 = activate(g1)
        c1 = f1 * c1 + i1 * gg1
        h1 = o1 * jnp.tanh(c1)
        return (h0, c0, h1, c1)

    h0, c0, h1, c1 = lax.fori_loop(0, T, step, (zeros, zeros, zeros, zeros),
                                   unroll=unroll)

    # ---- final: ReLU on top-layer hidden of last timestep, then Linear ----
    # (single epilogue store; O=8 < 128 lanes is one masked vst, negligible)
    relu_h = jnp.maximum(h1, 0.0)
    out_ref[...] = (jnp.dot(relu_h, wfc_ref[...],
                            preferred_element_type=jnp.float32)
                    + bfc_ref[...]).astype(out_ref.dtype)


def lstm_model_forward(x, params, *, batch_block=128, max_unroll=8):
    """x: (B, T, I) float32.  Returns (B, output_size)."""
    B, T, I = x.shape
    H = params["whh0"].shape[0]          # (H, 4H)
    O = params["wfc"].shape[1]           # (H, O)

    # Pad batch to 8 sublanes; for large B, pad to a multiple of `batch_block`
    # and shard batch blocks across grid programs marked "parallel" (uses the
    # second TensorCore on v7x).  Up to 128 rows per program are free MXU rows.
    if B <= batch_block:
        Bp = max(8, ((B + 7) // 8) * 8)
        Bb = Bp
    else:
        Bp = ((B + batch_block - 1) // batch_block) * batch_block
        Bb = batch_block
    nb = Bp // Bb

    x_pad = jnp.zeros((Bp, T, I), x.dtype).at[:B].set(x)
    x_tbi = jnp.transpose(x_pad, (1, 0, 2))                # (T, Bp, I)

    kernel = functools.partial(_lstm_fc_kernel, unroll=min(T, max_unroll))

    full = lambda shape: pl.BlockSpec(shape, lambda b: (0,) * len(shape))

    out = pl.pallas_call(
        kernel,
        out_shape=jax.ShapeDtypeStruct((Bp, O), jnp.float32),
        grid_spec=pltpu.PrefetchScalarGridSpec(
            num_scalar_prefetch=0,
            grid=(nb,),                          # batch blocks; T handled in-kernel
            in_specs=[
                pl.BlockSpec((T, Bb, I), lambda b: (0, b, 0)),   # x
                full((I, 4 * H)),                # W_ih layer0 (transposed)
                full((1, 4 * H)),                # bias layer0 (b_ih + b_hh)
                full((H, 4 * H)),                # W_hh layer0 (transposed)
                full((H, 4 * H)),                # W_ih layer1 (transposed)
                full((H, 4 * H)),                # W_hh layer1 (transposed)
                full((1, 4 * H)),                # bias layer1
                full((H, O)),                    # fc weight (transposed)
                full((1, O)),                    # fc bias
            ],
            out_specs=pl.BlockSpec((Bb, O), lambda b: (b, 0)),
            scratch_shapes=[pltpu.VMEM((T, Bb, 4 * H), jnp.float32)],
        ),
        compiler_params=pltpu.CompilerParams(
            dimension_semantics=("parallel",)),
    )(x_tbi,
      params["wih0"], params["b0"], params["whh0"],
      params["wih1"], params["whh1"], params["b1"],
      params["wfc"], params["bfc"])
    return out[:B]


def init_params(key, input_size, hidden_size, output_size):
    """Deterministic init mimicking PyTorch's U(-1/sqrt(H), 1/sqrt(H))."""
    H = hidden_size
    k = 1.0 / jnp.sqrt(jnp.float32(H))
    keys = jax.random.split(key, 12)
    u = lambda kk, shape: jax.random.uniform(kk, shape, jnp.float32, -k, k)
    params = {
        # stored already transposed for `x @ W` inside the kernel
        "wih0": u(keys[0], (input_size, 4 * H)),
        "whh0": u(keys[1], (H, 4 * H)),
        "b0":   (u(keys[2], (1, 4 * H)) + u(keys[3], (1, 4 * H))),  # b_ih + b_hh
        "wih1": u(keys[4], (H, 4 * H)),
        "whh1": u(keys[5], (H, 4 * H)),
        "b1":   (u(keys[6], (1, 4 * H)) + u(keys[7], (1, 4 * H))),
        "wfc":  u(keys[8], (H, output_size)),
        "bfc":  u(keys[9], (1, output_size)),
    }
    return params


def reference_forward(x, params):
    """Pure-JAX reference (lax.scan) with identical semantics, for validation."""
    B, T, I = x.shape
    H = params["whh0"].shape[0]

    def cell(h, c, inp, wih, whh, b):
        g = inp @ wih + h @ whh + b
        i = jax.nn.sigmoid(g[:, 0 * H:1 * H])
        f = jax.nn.sigmoid(g[:, 1 * H:2 * H])
        gg = jnp.tanh(g[:, 2 * H:3 * H])
        o = jax.nn.sigmoid(g[:, 3 * H:4 * H])
        c = f * c + i * gg
        h = o * jnp.tanh(c)
        return h, c

    def step(carry, x_t):
        h0, c0, h1, c1 = carry
        h0, c0 = cell(h0, c0, x_t, params["wih0"], params["whh0"], params["b0"])
        h1, c1 = cell(h1, c1, h0, params["wih1"], params["whh1"], params["b1"])
        return (h0, c0, h1, c1), h1

    init = tuple(jnp.zeros((B, H), jnp.float32) for _ in range(4))
    (_, _, h1, _), _ = jax.lax.scan(step, init, jnp.transpose(x, (1, 0, 2)))
    return jnp.maximum(h1, 0.0) @ params["wfc"] + params["bfc"]


if __name__ == "__main__":
    input_size, hidden_size, output_size = 16, 32, 8
    batch, seq = 2, 8

    key = jax.random.PRNGKey(0)
    kx, kp = jax.random.split(key)
    x = jax.random.normal(kx, (batch, seq, input_size), jnp.float32)
    params = init_params(kp, input_size, hidden_size, output_size)

    out = lstm_model_forward(x, params)
    out = jax.block_until_ready(out)

    ref = jax.block_until_ready(reference_forward(x, params))
    assert out.shape == (batch, output_size)
    assert jnp.allclose(out, ref, atol=1e-5, rtol=1e-4), (out, ref)

    print("KERNEL_OK")
</pallas_src>

<mosaic_0001>
module attributes {stable_mosaic.version = 11 : i64} {
  func.func @_lstm_fc_kernel(%arg0: i32, %arg1: memref<8x8x16xf32, #tpu.memory_space<vmem>>, %arg2: memref<16x128xf32, #tpu.memory_space<vmem>>, %arg3: memref<1x128xf32, #tpu.memory_space<vmem>>, %arg4: memref<32x128xf32, #tpu.memory_space<vmem>>, %arg5: memref<32x128xf32, #tpu.memory_space<vmem>>, %arg6: memref<32x128xf32, #tpu.memory_space<vmem>>, %arg7: memref<1x128xf32, #tpu.memory_space<vmem>>, %arg8: memref<32x8xf32, #tpu.memory_space<vmem>>, %arg9: memref<1x8xf32, #tpu.memory_space<vmem>>, %arg10: memref<8x8xf32, #tpu.memory_space<vmem>>, %arg11: memref<8x8x128xf32, #tpu.memory_space<vmem>>) attributes {dimension_semantics = [#tpu.dimension_semantics<parallel>], iteration_bounds = array<i64: 1>, scalar_prefetch = 0 : i64, scratch_operands = 1 : i64, tpu.core_type = #tpu.core_type<tc>, window_params = [{transform_indices = @transform_0, window_bounds = array<i64: 8, 8, 16>}, {pipeline_mode = #tpu.pipeline_mode<synchronous>, transform_indices = @transform_1, window_bounds = array<i64: 16, 128>}, {pipeline_mode = #tpu.pipeline_mode<synchronous>, transform_indices = @transform_2, window_bounds = array<i64: 1, 128>}, {pipeline_mode = #tpu.pipeline_mode<synchronous>, transform_indices = @transform_3, window_bounds = array<i64: 32, 128>}, {pipeline_mode = #tpu.pipeline_mode<synchronous>, transform_indices = @transform_4, window_bounds = array<i64: 32, 128>}, {pipeline_mode = #tpu.pipeline_mode<synchronous>, transform_indices = @transform_5, window_bounds = array<i64: 32, 128>}, {pipeline_mode = #tpu.pipeline_mode<synchronous>, transform_indices = @transform_6, window_bounds = array<i64: 1, 128>}, {pipeline_mode = #tpu.pipeline_mode<synchronous>, transform_indices = @transform_7, window_bounds = array<i64: 32, 8>}, {pipeline_mode = #tpu.pipeline_mode<synchronous>, transform_indices = @transform_8, window_bounds = array<i64: 1, 8>}, {transform_indices = @transform_9, window_bounds = array<i64: 8, 8>}]} {
    %c0 = arith.constant 0 : index
    %c0_0 = arith.constant 0 : index
    %c0_1 = arith.constant 0 : index
    %0 = vector.load %arg1[%c0, %c0_0, %c0_1] : memref<8x8x16xf32, #tpu.memory_space<vmem>>, vector<8x8x16xf32>
    %1 = vector.shape_cast %0 : vector<8x8x16xf32> to vector<64x16xf32>
    %c0_2 = arith.constant 0 : index
    %c0_3 = arith.constant 0 : index
    %2 = vector.load %arg2[%c0_2, %c0_3] : memref<16x128xf32, #tpu.memory_space<vmem>>, vector<16x128xf32>
    %cst = arith.constant dense<0.000000e+00> : vector<64x128xf32>
    %3 = tpu.matmul %1, %2, %cst {dimension_numbers = #tpu.dot_dimension_numbers<[1], [0], [0], [1], [0, 0, 1, 1], [], []>} : vector<64x16xf32>, vector<16x128xf32>, vector<64x128xf32> -> vector<64x128xf32>
    %c0_4 = arith.constant 0 : index
    %c0_5 = arith.constant 0 : index
    %4 = vector.load %arg3[%c0_4, %c0_5] : memref<1x128xf32, #tpu.memory_space<vmem>>, vector<1x128xf32>
    %5 = vector.broadcast %4 : vector<1x128xf32> to vector<64x128xf32>
    %6 = arith.addf %3, %5 : vector<64x128xf32>
    %7 = vector.shape_cast %6 : vector<64x128xf32> to vector<8x8x128xf32>
    %c0_6 = arith.constant 0 : index
    %c0_7 = arith.constant 0 : index
    %c0_8 = arith.constant 0 : index
    %8 = vector.load %arg11[%c0_6, %c0_7, %c0_8] : memref<8x8x128xf32, #tpu.memory_space<vmem>>, vector<8x8x128xf32>
    tpu.vector_store %arg11[%c0_6, %c0_7, %c0_8], %7 {strides = array<i32>} : memref<8x8x128xf32, #tpu.memory_space<vmem>>, vector<8x8x128xf32>,
    %c0_9 = arith.constant 0 : index
    %c0_10 = arith.constant 0 : index
    %9 = vector.load %arg4[%c0_9, %c0_10] : memref<32x128xf32, #tpu.memory_space<vmem>>, vector<32x128xf32>
    %c0_11 = arith.constant 0 : index
    %c0_12 = arith.constant 0 : index
    %10 = vector.load %arg5[%c0_11, %c0_12] : memref<32x128xf32, #tpu.memory_space<vmem>>, vector<32x128xf32>
    %c0_13 = arith.constant 0 : index
    %c0_14 = arith.constant 0 : index
    %11 = vector.load %arg6[%c0_13, %c0_14] : memref<32x128xf32, #tpu.memory_space<vmem>>, vector<32x128xf32>
    %c0_15 = arith.constant 0 : index
    %c0_16 = arith.constant 0 : index
    %12 = vector.load %arg7[%c0_15, %c0_16] : memref<1x128xf32, #tpu.memory_space<vmem>>, vector<1x128xf32>
    %13 = vector.shape_cast %12 : vector<1x128xf32> to vector<1x128xf32>
    %14 = vector.broadcast %13 : vector<1x128xf32> to vector<8x128xf32>
    %cst_17 = arith.constant 0.000000e+00 : f32
    %15 = vector.broadcast %cst_17 : f32 to vector<8x32xf32>
    %c0_i32 = arith.constant 0 : i32
    %cst_18 = arith.constant dense<0.000000e+00> : vector<8x128xf32>
    %16 = tpu.matmul %15, %9, %cst_18 {dimension_numbers = #tpu.dot_dimension_numbers<[1], [0], [0], [1], [0, 0, 1, 1], [], []>} : vector<8x32xf32>, vector<32x128xf32>, vector<8x128xf32> -> vector<8x128xf32>
    %cst_19 = arith.constant dense<0.000000e+00> : vector<8x128xf32>
    %17 = tpu.matmul %15, %11, %cst_19 {dimension_numbers = #tpu.dot_dimension_numbers<[1], [0], [0], [1], [0, 0, 1, 1], [], []>} : vector<8x32xf32>, vector<32x128xf32>, vector<8x128xf32> -> vector<8x128xf32>
    %18 = arith.index_cast %c0_i32 : i32 to index
    %c0_20 = arith.constant 0 : index
    %c0_21 = arith.constant 0 : index
    %19 = vector.load %arg11[%18, %c0_20, %c0_21] : memref<8x8x128xf32, #tpu.memory_space<vmem>>, vector<1x8x128xf32>
    %20 = vector.shape_cast %19 : vector<1x8x128xf32> to vector<8x128xf32>
    %21 = arith.addf %20, %16 : vector<8x128xf32>
    %22 = arith.negf %21 : vector<8x128xf32>
    %23 = math.exp %22 : vector<8x128xf32>
    %cst_22 = arith.constant 1.000000e+00 : f32
    %24 = vector.broadcast %cst_22 : f32 to vector<8x128xf32>
    %25 = arith.addf %24, %23 : vector<8x128xf32>
    %26 = arith.divf %24, %25 : vector<8x128xf32>
    %27 = math.tanh %21 : vector<8x128xf32>
    %28 = vector.extract_strided_slice %26 {offsets = [0, 0], sizes = [8, 32], strides = [1, 1]} : vector<8x128xf32> to vector<8x32xf32>
    %29 = vector.extract_strided_slice %26 {offsets = [0, 32], sizes = [8, 32], strides = [1, 1]} : vector<8x128xf32> to vector<8x32xf32>
    %30 = vector.extract_strided_slice %27 {offsets = [0, 64], sizes = [8, 32], strides = [1, 1]} : vector<8x128xf32> to vector<8x32xf32>
    %31 = vector.extract_strided_slice %26 {offsets = [0, 96], sizes = [8, 32], strides = [1, 1]} : vector<8x128xf32> to vector<8x32xf32>
    %32 = arith.mulf %29, %15 : vector<8x32xf32>
    %33 = arith.mulf %28, %30 : vector<8x32xf32>
    %34 = arith.addf %32, %33 : vector<8x32xf32>
    %35 = math.tanh %34 : vector<8x32xf32>
    %36 = arith.mulf %31, %35 : vector<8x32xf32>
    %cst_23 = arith.constant dense<0.000000e+00> : vector<8x128xf32>
    %37 = tpu.matmul %36, %10, %cst_23 {dimension_numbers = #tpu.dot_dimension_numbers<[1], [0], [0], [1], [0, 0, 1, 1], [], []>} : vector<8x32xf32>, vector<32x128xf32>, vector<8x128xf32> -> vector<8x128xf32>
    %38 = arith.addf %37, %17 : vector<8x128xf32>
    %39 = arith.addf %38, %14 : vector<8x128xf32>
    %40 = arith.negf %39 : vector<8x128xf32>
    %41 = math.exp %40 : vector<8x128xf32>
    %cst_24 = arith.constant 1.000000e+00 : f32
    %42 = vector.broadcast %cst_24 : f32 to vector<8x128xf32>
    %43 = arith.addf %42, %41 : vector<8x128xf32>
    %44 = arith.divf %42, %43 : vector<8x128xf32>
    %45 = math.tanh %39 : vector<8x128xf32>
    %46 = vector.extract_strided_slice %44 {offsets = [0, 0], sizes = [8, 32], strides = [1, 1]} : vector<8x128xf32> to vector<8x32xf32>
    %47 = vector.extract_strided_slice %44 {offsets = [0, 32], sizes = [8, 32], strides = [1, 1]} : vector<8x128xf32> to vector<8x32xf32>
    %48 = vector.extract_strided_slice %45 {offsets = [0, 64], sizes = [8, 32], strides = [1, 1]} : vector<8x128xf32> to vector<8x32xf32>
    %49 = vector.extract_strided_slice %44 {offsets = [0, 96], sizes = [8, 32], strides = [1, 1]} : vector<8x128xf32> to vector<8x32xf32>
    %50 = arith.mulf %47, %15 : vector<8x32xf32>
    %51 = arith.mulf %46, %48 : vector<8x32xf32>
    %52 = arith.addf %50, %51 : vector<8x32xf32>
    %53 = math.tanh %52 : vector<8x32xf32>
    %54 = arith.mulf %49, %53 : vector<8x32xf32>
    %c1_i32 = arith.constant 1 : i32
    %cst_25 = arith.constant dense<0.000000e+00> : vector<8x128xf32>
    %55 = tpu.matmul %36, %9, %cst_25 {dimension_numbers = #tpu.dot_dimension_numbers<[1], [0], [0], [1], [0, 0, 1, 1], [], []>} : vector<8x32xf32>, vector<32x128xf32>, vector<8x128xf32> -> vector<8x128xf32>
    %cst_26 = arith.constant dense<0.000000e+00> : vector<8x128xf32>
    %56 = tpu.matmul %54, %11, %cst_26 {dimension_numbers = #tpu.dot_dimension_numbers<[1], [0], [0], [1], [0, 0, 1, 1], [], []>} : vector<8x32xf32>, vector<32x128xf32>, vector<8x128xf32> -> vector<8x128xf32>
    %57 = arith.index_cast %c1_i32 : i32 to index
    %c0_27 = arith.constant 0 : index
    %c0_28 = arith.constant 0 : index
    %58 = vector.load %arg11[%57, %c0_27, %c0_28] : memref<8x8x128xf32, #tpu.memory_space<vmem>>, vector<1x8x128xf32>
    %59 = vector.shape_cast %58 : vector<1x8x128xf32> to vector<8x128xf32>
    %60 = arith.addf %59, %55 : vector<8x128xf32>
    %61 = arith.negf %60 : vector<8x128xf32>
    %62 = math.exp %61 : vector<8x128xf32>
    %cst_29 = arith.constant 1.000000e+00 : f32
    %63 = vector.broadcast %cst_29 : f32 to vector<8x128xf32>
    %64 = arith.addf %63, %62 : vector<8x128xf32>
    %65 = arith.divf %63, %64 : vector<8x128xf32>
    %66 = math.tanh %60 : vector<8x128xf32>
    %67 = vector.extract_strided_slice %65 {offsets = [0, 0], sizes = [8, 32], strides = [1, 1]} : vector<8x128xf32> to vector<8x32xf32>
    %68 = vector.extract_strided_slice %65 {offsets = [0, 32], sizes = [8, 32], strides = [1, 1]} : vector<8x128xf32> to vector<8x32xf32>
    %69 = vector.extract_strided_slice %66 {offsets = [0, 64], sizes = [8, 32], strides = [1, 1]} : vector<8x128xf32> to vector<8x32xf32>
    %70 = vector.extract_strided_slice %65 {offsets = [0, 96], sizes = [8, 32], strides = [1, 1]} : vector<8x128xf32> to vector<8x32xf32>
    %71 = arith.mulf %68, %34 : vector<8x32xf32>
    %72 = arith.mulf %67, %69 : vector<8x32xf32>
    %73 = arith.addf %71, %72 : vector<8x32xf32>
    %74 = math.tanh %73 : vector<8x32xf32>
    %75 = arith.mulf %70, %74 : vector<8x32xf32>
    %cst_30 = arith.constant dense<0.000000e+00> : vector<8x128xf32>
    %76 = tpu.matmul %75, %10, %cst_30 {dimension_numbers = #tpu.dot_dimension_numbers<[1], [0], [0], [1], [0, 0, 1, 1], [], []>} : vector<8x32xf32>, vector<32x128xf32>, vector<8x128xf32> -> vector<8x128xf32>
    %77 = arith.addf %76, %56 : vector<8x128xf32>
    %78 = arith.addf %77, %14 : vector<8x128xf32>
    %79 = arith.negf %78 : vector<8x128xf32>
    %80 = math.exp %79 : vector<8x128xf32>
    %cst_31 = arith.constant 1.000000e+00 : f32
    %81 = vector.broadcast %cst_31 : f32 to vector<8x128xf32>
    %82 = arith.addf %81, %80 : vector<8x128xf32>
    %83 = arith.divf %81, %82 : vector<8x128xf32>
    %84 = math.tanh %78 : vector<8x128xf32>
    %85 = vector.extract_strided_slice %83 {offsets = [0, 0], sizes = [8, 32], strides = [1, 1]} : vector<8x128xf32> to vector<8x32xf32>
    %86 = vector.extract_strided_slice %83 {offsets = [0, 32], sizes = [8, 32], strides = [1, 1]} : vector<8x128xf32> to vector<8x32xf32>
    %87 = vector.extract_strided_slice %84 {offsets = [0, 64], sizes = [8, 32], strides = [1, 1]} : vector<8x128xf32> to vector<8x32xf32>
    %88 = vector.extract_strided_slice %83 {offsets = [0, 96], sizes = [8, 32], strides = [1, 1]} : vector<8x128xf32> to vector<8x32xf32>
    %89 = arith.mulf %86, %52 : vector<8x32xf32>
    %90 = arith.mulf %85, %87 : vector<8x32xf32>
    %91 = arith.addf %89, %90 : vector<8x32xf32>
    %92 = math.tanh %91 : vector<8x32xf32>
    %93 = arith.mulf %88, %92 : vector<8x32xf32>
    %c2_i32 = arith.constant 2 : i32
    %cst_32 = arith.constant dense<0.000000e+00> : vector<8x128xf32>
    %94 = tpu.matmul %75, %9, %cst_32 {dimension_numbers = #tpu.dot_dimension_numbers<[1], [0], [0], [1], [0, 0, 1, 1], [], []>} : vector<8x32xf32>, vector<32x128xf32>, vector<8x128xf32> -> vector<8x128xf32>
    %cst_33 = arith.constant dense<0.000000e+00> : vector<8x128xf32>
    %95 = tpu.matmul %93, %11, %cst_33 {dimension_numbers = #tpu.dot_dimension_numbers<[1], [0], [0], [1], [0, 0, 1, 1], [], []>} : vector<8x32xf32>, vector<32x128xf32>, vector<8x128xf32> -> vector<8x128xf32>
    %96 = arith.index_cast %c2_i32 : i32 to index
    %c0_34 = arith.constant 0 : index
    %c0_35 = arith.constant 0 : index
    %97 = vector.load %arg11[%96, %c0_34, %c0_35] : memref<8x8x128xf32, #tpu.memory_space<vmem>>, vector<1x8x128xf32>
    %98 = vector.shape_cast %97 : vector<1x8x128xf32> to vector<8x128xf32>
    %99 = arith.addf %98, %94 : vector<8x128xf32>
    %100 = arith.negf %99 : vector<8x128xf32>
    %101 = math.exp %100 : vector<8x128xf32>
    %cst_36 = arith.constant 1.000000e+00 : f32
    %102 = vector.broadcast %cst_36 : f32 to vector<8x128xf32>
    %103 = arith.addf %102, %101 : vector<8x128xf32>
    %104 = arith.divf %102, %103 : vector<8x128xf32>
    %105 = math.tanh %99 : vector<8x128xf32>
    %106 = vector.extract_strided_slice %104 {offsets = [0, 0], sizes = [8, 32], strides = [1, 1]} : vector<8x128xf32> to vector<8x32xf32>
    %107 = vector.extract_strided_slice %104 {offsets = [0, 32], sizes = [8, 32], strides = [1, 1]} : vector<8x128xf32> to vector<8x32xf32>
    %108 = vector.extract_strided_slice %105 {offsets = [0, 64], sizes = [8, 32], strides = [1, 1]} : vector<8x128xf32> to vector<8x32xf32>
    %109 = vector.extract_strided_slice %104 {offsets = [0, 96], sizes = [8, 32], strides = [1, 1]} : vector<8x128xf32> to vector<8x32xf32>
    %110 = arith.mulf %107, %73 : vector<8x32xf32>
    %111 = arith.mulf %106, %108 : vector<8x32xf32>
    %112 = arith.addf %110, %111 : vector<8x32xf32>
    %113 = math.tanh %112 : vector<8x32xf32>
    %114 = arith.mulf %109, %113 : vector<8x32xf32>
    %cst_37 = arith.constant dense<0.000000e+00> : vector<8x128xf32>
    %115 = tpu.matmul %114, %10, %cst_37 {dimension_numbers = #tpu.dot_dimension_numbers<[1], [0], [0], [1], [0, 0, 1, 1], [], []>} : vector<8x32xf32>, vector<32x128xf32>, vector<8x128xf32> -> vector<8x128xf32>
    %116 = arith.addf %115, %95 : vector<8x128xf32>
    %117 = arith.addf %116, %14 : vector<8x128xf32>
    %118 = arith.negf %117 : vector<8x128xf32>
    %119 = math.exp %118 : vector<8x128xf32>
    %cst_38 = arith.constant 1.000000e+00 : f32
    %120 = vector.broadcast %cst_38 : f32 to vector<8x128xf32>
    %121 = arith.addf %120, %119 : vector<8x128xf32>
    %122 = arith.divf %120, %121 : vector<8x128xf32>
    %123 = math.tanh %117 : vector<8x128xf32>
    %124 = vector.extract_strided_slice %122 {offsets = [0, 0], sizes = [8, 32], strides = [1, 1]} : vector<8x128xf32> to vector<8x32xf32>
    %125 = vector.extract_strided_slice %122 {offsets = [0, 32], sizes = [8, 32], strides = [1, 1]} : vector<8x128xf32> to vector<8x32xf32>
    %126 = vector.extract_strided_slice %123 {offsets = [0, 64], sizes = [8, 32], strides = [1, 1]} : vector<8x128xf32> to vector<8x32xf32>
    %127 = vector.extract_strided_slice %122 {offsets = [0, 96], sizes = [8, 32], strides = [1, 1]} : vector<8x128xf32> to vector<8x32xf32>
    %128 = arith.mulf %125, %91 : vector<8x32xf32>
    %129 = arith.mulf %124, %126 : vector<8x32xf32>
    %130 = arith.addf %128, %129 : vector<8x32xf32>
    %131 = math.tanh %130 : vector<8x32xf32>
    %132 = arith.mulf %127, %131 : vector<8x32xf32>
    %c3_i32 = arith.constant 3 : i32
    %cst_39 = arith.constant dense<0.000000e+00> : vector<8x128xf32>
    %133 = tpu.matmul %114, %9, %cst_39 {dimension_numbers = #tpu.dot_dimension_numbers<[1], [0], [0], [1], [0, 0, 1, 1], [], []>} : vector<8x32xf32>, vector<32x128xf32>, vector<8x128xf32> -> vector<8x128xf32>
    %cst_40 = arith.constant dense<0.000000e+00> : vector<8x128xf32>
    %134 = tpu.matmul %132, %11, %cst_40 {dimension_numbers = #tpu.dot_dimension_numbers<[1], [0], [0], [1], [0, 0, 1, 1], [], []>} : vector<8x32xf32>, vector<32x128xf32>, vector<8x128xf32> -> vector<8x128xf32>
    %135 = arith.index_cast %c3_i32 : i32 to index
    %c0_41 = arith.constant 0 : index
    %c0_42 = arith.constant 0 : index
    %136 = vector.load %arg11[%135, %c0_41, %c0_42] : memref<8x8x128xf32, #tpu.memory_space<vmem>>, vector<1x8x128xf32>
    %137 = vector.shape_cast %136 : vector<1x8x128xf32> to vector<8x128xf32>
    %138 = arith.addf %137, %133 : vector<8x128xf32>
    %139 = arith.negf %138 : vector<8x128xf32>
    %140 = math.exp %139 : vector<8x128xf32>
    %cst_43 = arith.constant 1.000000e+00 : f32
    %141 = vector.broadcast %cst_43 : f32 to vector<8x128xf32>
    %142 = arith.addf %141, %140 : vector<8x128xf32>
    %143 = arith.divf %141, %142 : vector<8x128xf32>
    %144 = math.tanh %138 : vector<8x128xf32>
    %145 = vector.extract_strided_slice %143 {offsets = [0, 0], sizes = [8, 32], strides = [1, 1]} : vector<8x128xf32> to vector<8x32xf32>
    %146 = vector.extract_strided_slice %143 {offsets = [0, 32], sizes = [8, 32], strides = [1, 1]} : vector<8x128xf32> to vector<8x32xf32>
    %147 = vector.extract_strided_slice %144 {offsets = [0, 64], sizes = [8, 32], strides = [1, 1]} : vector<8x128xf32> to vector<8x32xf32>
    %148 = vector.extract_strided_slice %143 {offsets = [0, 96], sizes = [8, 32], strides = [1, 1]} : vector<8x128xf32> to vector<8x32xf32>
    %149 = arith.mulf %146, %112 : vector<8x32xf32>
    %150 = arith.mulf %145, %147 : vector<8x32xf32>
    %151 = arith.addf %149, %150 : vector<8x32xf32>
    %152 = math.tanh %151 : vector<8x32xf32>
    %153 = arith.mulf %148, %152 : vector<8x32xf32>
    %cst_44 = arith.constant dense<0.000000e+00> : vector<8x128xf32>
    %154 = tpu.matmul %153, %10, %cst_44 {dimension_numbers = #tpu.dot_dimension_numbers<[1], [0], [0], [1], [0, 0, 1, 1], [], []>} : vector<8x32xf32>, vector<32x128xf32>, vector<8x128xf32> -> vector<8x128xf32>
    %155 = arith.addf %154, %134 : vector<8x128xf32>
    %156 = arith.addf %155, %14 : vector<8x128xf32>
    %157 = arith.negf %156 : vector<8x128xf32>
    %158 = math.exp %157 : vector<8x128xf32>
    %cst_45 = arith.constant 1.000000e+00 : f32
    %159 = vector.broadcast %cst_45 : f32 to vector<8x128xf32>
    %160 = arith.addf %159, %158 : vector<8x128xf32>
    %161 = arith.divf %159, %160 : vector<8x128xf32>
    %162 = math.tanh %156 : vector<8x128xf32>
    %163 = vector.extract_strided_slice %161 {offsets = [0, 0], sizes = [8, 32], strides = [1, 1]} : vector<8x128xf32> to vector<8x32xf32>
    %164 = vector.extract_strided_slice %161 {offsets = [0, 32], sizes = [8, 32], strides = [1, 1]} : vector<8x128xf32> to vector<8x32xf32>
    %165 = vector.extract_strided_slice %162 {offsets = [0, 64], sizes = [8, 32], strides = [1, 1]} : vector<8x128xf32> to vector<8x32xf32>
    %166 = vector.extract_strided_slice %161 {offsets = [0, 96], sizes = [8, 32], strides = [1, 1]} : vector<8x128xf32> to vector<8x32xf32>
    %167 = arith.mulf %164, %130 : vector<8x32xf32>
    %168 = arith.mulf %163, %165 : vector<8x32xf32>
    %169 = arith.addf %167, %168 : vector<8x32xf32>
    %170 = math.tanh %169 : vector<8x32xf32>
    %171 = arith.mulf %166, %170 : vector<8x32xf32>
    %c4_i32 = arith.constant 4 : i32
    %cst_46 = arith.constant dense<0.000000e+00> : vector<8x128xf32>
    %172 = tpu.matmul %153, %9, %cst_46 {dimension_numbers = #tpu.dot_dimension_numbers<[1], [0], [0], [1], [0, 0, 1, 1], [], []>} : vector<8x32xf32>, vector<32x128xf32>, vector<8x128xf32> -> vector<8x128xf32>
    %cst_47 = arith.constant dense<0.000000e+00> : vector<8x128xf32>
    %173 = tpu.matmul %171, %11, %cst_47 {dimension_numbers = #tpu.dot_dimension_numbers<[1], [0], [0], [1], [0, 0, 1, 1], [], []>} : vector<8x32xf32>, vector<32x128xf32>, vector<8x128xf32> -> vector<8x128xf32>
    %174 = arith.index_cast %c4_i32 : i32 to index
    %c0_48 = arith.constant 0 : index
    %c0_49 = arith.constant 0 : index
    %175 = vector.load %arg11[%174, %c0_48, %c0_49] : memref<8x8x128xf32, #tpu.memory_space<vmem>>, vector<1x8x128xf32>
    %176 = vector.shape_cast %175 : vector<1x8x128xf32> to vector<8x128xf32>
    %177 = arith.addf %176, %172 : vector<8x128xf32>
    %178 = arith.negf %177 : vector<8x128xf32>
    %179 = math.exp %178 : vector<8x128xf32>
    %cst_50 = arith.constant 1.000000e+00 : f32
    %180 = vector.broadcast %cst_50 : f32 to vector<8x128xf32>
    %181 = arith.addf %180, %179 : vector<8x128xf32>
    %182 = arith.divf %180, %181 : vector<8x128xf32>
    %183 = math.tanh %177 : vector<8x128xf32>
    %184 = vector.extract_strided_slice %182 {offsets = [0, 0], sizes = [8, 32], strides = [1, 1]} : vector<8x128xf32> to vector<8x32xf32>
    %185 = vector.extract_strided_slice %182 {offsets = [0, 32], sizes = [8, 32], strides = [1, 1]} : vector<8x128xf32> to vector<8x32xf32>
    %186 = vector.extract_strided_slice %183 {offsets = [0, 64], sizes = [8, 32], strides = [1, 1]} : vector<8x128xf32> to vector<8x32xf32>
    %187 = vector.extract_strided_slice %182 {offsets = [0, 96], sizes = [8, 32], strides = [1, 1]} : vector<8x128xf32> to vector<8x32xf32>
    %188 = arith.mulf %185, %151 : vector<8x32xf32>
    %189 = arith.mulf %184, %186 : vector<8x32xf32>
    %190 = arith.addf %188, %189 : vector<8x32xf32>
    %191 = math.tanh %190 : vector<8x32xf32>
    %192 = arith.mulf %187, %191 : vector<8x32xf32>
    %cst_51 = arith.constant dense<0.000000e+00> : vector<8x128xf32>
    %193 = tpu.matmul %192, %10, %cst_51 {dimension_numbers = #tpu.dot_dimension_numbers<[1], [0], [0], [1], [0, 0, 1, 1], [], []>} : vector<8x32xf32>, vector<32x128xf32>, vector<8x128xf32> -> vector<8x128xf32>
    %194 = arith.addf %193, %173 : vector<8x128xf32>
    %195 = arith.addf %194, %14 : vector<8x128xf32>
    %196 = arith.negf %195 : vector<8x128xf32>
    %197 = math.exp %196 : vector<8x128xf32>
    %cst_52 = arith.constant 1.000000e+00 : f32
    %198 = vector.broadcast %cst_52 : f32 to vector<8x128xf32>
    %199 = arith.addf %198, %197 : vector<8x128xf32>
    %200 = arith.divf %198, %199 : vector<8x128xf32>
    %201 = math.tanh %195 : vector<8x128xf32>
    %202 = vector.extract_strided_slice %200 {offsets = [0, 0], sizes = [8, 32], strides = [1, 1]} : vector<8x128xf32> to vector<8x32xf32>
    %203 = vector.extract_strided_slice %200 {offsets = [0, 32], sizes = [8, 32], strides = [1, 1]} : vector<8x128xf32> to vector<8x32xf32>
    %204 = vector.extract_strided_slice %201 {offsets = [0, 64], sizes = [8, 32], strides = [1, 1]} : vector<8x128xf32> to vector<8x32xf32>
    %205 = vector.extract_strided_slice %200 {offsets = [0, 96], sizes = [8, 32], strides = [1, 1]} : vector<8x128xf32> to vector<8x32xf32>
    %206 = arith.mulf %203, %169 : vector<8x32xf32>
    %207 = arith.mulf %202, %204 : vector<8x32xf32>
    %208 = arith.addf %206, %207 : vector<8x32xf32>
    %209 = math.tanh %208 : vector<8x32xf32>
    %210 = arith.mulf %205, %209 : vector<8x32xf32>
    %c5_i32 = arith.constant 5 : i32
    %cst_53 = arith.constant dense<0.000000e+00> : vector<8x128xf32>
    %211 = tpu.matmul %192, %9, %cst_53 {dimension_numbers = #tpu.dot_dimension_numbers<[1], [0], [0], [1], [0, 0, 1, 1], [], []>} : vector<8x32xf32>, vector<32x128xf32>, vector<8x128xf32> -> vector<8x128xf32>
    %cst_54 = arith.constant dense<0.000000e+00> : vector<8x128xf32>
    %212 = tpu.matmul %210, %11, %cst_54 {dimension_numbers = #tpu.dot_dimension_numbers<[1], [0], [0], [1], [0, 0, 1, 1], [], []>} : vector<8x32xf32>, vector<32x128xf32>, vector<8x128xf32> -> vector<8x128xf32>
    %213 = arith.index_cast %c5_i32 : i32 to index
    %c0_55 = arith.constant 0 : index
    %c0_56 = arith.constant 0 : index
    %214 = vector.load %arg11[%213, %c0_55, %c0_56] : memref<8x8x128xf32, #tpu.memory_space<vmem>>, vector<1x8x128xf32>
    %215 = vector.shape_cast %214 : vector<1x8x128xf32> to vector<8x128xf32>
    %216 = arith.addf %215, %211 : vector<8x128xf32>
    %217 = arith.negf %216 : vector<8x128xf32>
    %218 = math.exp %217 : vector<8x128xf32>
    %cst_57 = arith.constant 1.000000e+00 : f32
    %219 = vector.broadcast %cst_57 : f32 to vector<8x128xf32>
    %220 = arith.addf %219, %218 : vector<8x128xf32>
    %221 = arith.divf %219, %220 : vector<8x128xf32>
    %222 = math.tanh %216 : vector<8x128xf32>
    %223 = vector.extract_strided_slice %221 {offsets = [0, 0], sizes = [8, 32], strides = [1, 1]} : vector<8x128xf32> to vector<8x32xf32>
    %224 = vector.extract_strided_slice %221 {offsets = [0, 32], sizes = [8, 32], strides = [1, 1]} : vector<8x128xf32> to vector<8x32xf32>
    %225 = vector.extract_strided_slice %222 {offsets = [0, 64], sizes = [8, 32], strides = [1, 1]} : vector<8x128xf32> to vector<8x32xf32>
    %226 = vector.extract_strided_slice %221 {offsets = [0, 96], sizes = [8, 32], strides = [1, 1]} : vector<8x128xf32> to vector<8x32xf32>
    %227 = arith.mulf %224, %190 : vector<8x32xf32>
    %228 = arith.mulf %223, %225 : vector<8x32xf32>
    %229 = arith.addf %227, %228 : vector<8x32xf32>
    %230 = math.tanh %229 : vector<8x32xf32>
    %231 = arith.mulf %226, %230 : vector<8x32xf32>
    %cst_58 = arith.constant dense<0.000000e+00> : vector<8x128xf32>
    %232 = tpu.matmul %231, %10, %cst_58 {dimension_numbers = #tpu.dot_dimension_numbers<[1], [0], [0], [1], [0, 0, 1, 1], [], []>} : vector<8x32xf32>, vector<32x128xf32>, vector<8x128xf32> -> vector<8x128xf32>
    %233 = arith.addf %232, %212 : vector<8x128xf32>
    %234 = arith.addf %233, %14 : vector<8x128xf32>
    %235 = arith.negf %234 : vector<8x128xf32>
    %236 = math.exp %235 : vector<8x128xf32>
    %cst_59 = arith.constant 1.000000e+00 : f32
    %237 = vector.broadcast %cst_59 : f32 to vector<8x128xf32>
    %238 = arith.addf %237, %236 : vector<8x128xf32>
    %239 = arith.divf %237, %238 : vector<8x128xf32>
    %240 = math.tanh %234 : vector<8x128xf32>
    %241 = vector.extract_strided_slice %239 {offsets = [0, 0], sizes = [8, 32], strides = [1, 1]} : vector<8x128xf32> to vector<8x32xf32>
    %242 = vector.extract_strided_slice %239 {offsets = [0, 32], sizes = [8, 32], strides = [1, 1]} : vector<8x128xf32> to vector<8x32xf32>
    %243 = vector.extract_strided_slice %240 {offsets = [0, 64], sizes = [8, 32], strides = [1, 1]} : vector<8x128xf32> to vector<8x32xf32>
    %244 = vector.extract_strided_slice %239 {offsets = [0, 96], sizes = [8, 32], strides = [1, 1]} : vector<8x128xf32> to vector<8x32xf32>
    %245 = arith.mulf %242, %208 : vector<8x32xf32>
    %246 = arith.mulf %241, %243 : vector<8x32xf32>
    %247 = arith.addf %245, %246 : vector<8x32xf32>
    %248 = math.tanh %247 : vector<8x32xf32>
    %249 = arith.mulf %244, %248 : vector<8x32xf32>
    %c6_i32 = arith.constant 6 : i32
    %cst_60 = arith.constant dense<0.000000e+00> : vector<8x128xf32>
    %250 = tpu.matmul %231, %9, %cst_60 {dimension_numbers = #tpu.dot_dimension_numbers<[1], [0], [0], [1], [0, 0, 1, 1], [], []>} : vector<8x32xf32>, vector<32x128xf32>, vector<8x128xf32> -> vector<8x128xf32>
    %cst_61 = arith.constant dense<0.000000e+00> : vector<8x128xf32>
    %251 = tpu.matmul %249, %11, %cst_61 {dimension_numbers = #tpu.dot_dimension_numbers<[1], [0], [0], [1], [0, 0, 1, 1], [], []>} : vector<8x32xf32>, vector<32x128xf32>, vector<8x128xf32> -> vector<8x128xf32>
    %252 = arith.index_cast %c6_i32 : i32 to index
    %c0_62 = arith.constant 0 : index
    %c0_63 = arith.constant 0 : index
    %253 = vector.load %arg11[%252, %c0_62, %c0_63] : memref<8x8x128xf32, #tpu.memory_space<vmem>>, vector<1x8x128xf32>
    %254 = vector.shape_cast %253 : vector<1x8x128xf32> to vector<8x128xf32>
    %255 = arith.addf %254, %250 : vector<8x128xf32>
    %256 = arith.negf %255 : vector<8x128xf32>
    %257 = math.exp %256 : vector<8x128xf32>
    %cst_64 = arith.constant 1.000000e+00 : f32
    %258 = vector.broadcast %cst_64 : f32 to vector<8x128xf32>
    %259 = arith.addf %258, %257 : vector<8x128xf32>
    %260 = arith.divf %258, %259 : vector<8x128xf32>
    %261 = math.tanh %255 : vector<8x128xf32>
    %262 = vector.extract_strided_slice %260 {offsets = [0, 0], sizes = [8, 32], strides = [1, 1]} : vector<8x128xf32> to vector<8x32xf32>
    %263 = vector.extract_strided_slice %260 {offsets = [0, 32], sizes = [8, 32], strides = [1, 1]} : vector<8x128xf32> to vector<8x32xf32>
    %264 = vector.extract_strided_slice %261 {offsets = [0, 64], sizes = [8, 32], strides = [1, 1]} : vector<8x128xf32> to vector<8x32xf32>
    %265 = vector.extract_strided_slice %260 {offsets = [0, 96], sizes = [8, 32], strides = [1, 1]} : vector<8x128xf32> to vector<8x32xf32>
    %266 = arith.mulf %263, %229 : vector<8x32xf32>
    %267 = arith.mulf %262, %264 : vector<8x32xf32>
    %268 = arith.addf %266, %267 : vector<8x32xf32>
    %269 = math.tanh %268 : vector<8x32xf32>
    %270 = arith.mulf %265, %269 : vector<8x32xf32>
    %cst_65 = arith.constant dense<0.000000e+00> : vector<8x128xf32>
    %271 = tpu.matmul %270, %10, %cst_65 {dimension_numbers = #tpu.dot_dimension_numbers<[1], [0], [0], [1], [0, 0, 1, 1], [], []>} : vector<8x32xf32>, vector<32x128xf32>, vector<8x128xf32> -> vector<8x128xf32>
    %272 = arith.addf %271, %251 : vector<8x128xf32>
    %273 = arith.addf %272, %14 : vector<8x128xf32>
    %274 = arith.negf %273 : vector<8x128xf32>
    %275 = math.exp %274 : vector<8x128xf32>
    %cst_66 = arith.constant 1.000000e+00 : f32
    %276 = vector.broadcast %cst_66 : f32 to vector<8x128xf32>
    %277 = arith.addf %276, %275 : vector<8x128xf32>
    %278 = arith.divf %276, %277 : vector<8x128xf32>
    %279 = math.tanh %273 : vector<8x128xf32>
    %280 = vector.extract_strided_slice %278 {offsets = [0, 0], sizes = [8, 32], strides = [1, 1]} : vector<8x128xf32> to vector<8x32xf32>
    %281 = vector.extract_strided_slice %278 {offsets = [0, 32], sizes = [8, 32], strides = [1, 1]} : vector<8x128xf32> to vector<8x32xf32>
    %282 = vector.extract_strided_slice %279 {offsets = [0, 64], sizes = [8, 32], strides = [1, 1]} : vector<8x128xf32> to vector<8x32xf32>
    %283 = vector.extract_strided_slice %278 {offsets = [0, 96], sizes = [8, 32], strides = [1, 1]} : vector<8x128xf32> to vector<8x32xf32>
    %284 = arith.mulf %281, %247 : vector<8x32xf32>
    %285 = arith.mulf %280, %282 : vector<8x32xf32>
    %286 = arith.addf %284, %285 : vector<8x32xf32>
    %287 = math.tanh %286 : vector<8x32xf32>
    %288 = arith.mulf %283, %287 : vector<8x32xf32>
    %c7_i32 = arith.constant 7 : i32
    %cst_67 = arith.constant dense<0.000000e+00> : vector<8x128xf32>
    %289 = tpu.matmul %270, %9, %cst_67 {dimension_numbers = #tpu.dot_dimension_numbers<[1], [0], [0], [1], [0, 0, 1, 1], [], []>} : vector<8x32xf32>, vector<32x128xf32>, vector<8x128xf32> -> vector<8x128xf32>
    %cst_68 = arith.constant dense<0.000000e+00> : vector<8x128xf32>
    %290 = tpu.matmul %288, %11, %cst_68 {dimension_numbers = #tpu.dot_dimension_numbers<[1], [0], [0], [1], [0, 0, 1, 1], [], []>} : vector<8x32xf32>, vector<32x128xf32>, vector<8x128xf32> -> vector<8x128xf32>
    %291 = arith.index_cast %c7_i32 : i32 to index
    %c0_69 = arith.constant 0 : index
    %c0_70 = arith.constant 0 : index
    %292 = vector.load %arg11[%291, %c0_69, %c0_70] : memref<8x8x128xf32, #tpu.memory_space<vmem>>, vector<1x8x128xf32>
    %293 = vector.shape_cast %292 : vector<1x8x128xf32> to vector<8x128xf32>
    %294 = arith.addf %293, %289 : vector<8x128xf32>
    %295 = arith.negf %294 : vector<8x128xf32>
    %296 = math.exp %295 : vector<8x128xf32>
    %cst_71 = arith.constant 1.000000e+00 : f32
    %297 = vector.broadcast %cst_71 : f32 to vector<8x128xf32>
    %298 = arith.addf %297, %296 : vector<8x128xf32>
    %299 = arith.divf %297, %298 : vector<8x128xf32>
    %300 = math.tanh %294 : vector<8x128xf32>
    %301 = vector.extract_strided_slice %299 {offsets = [0, 0], sizes = [8, 32], strides = [1, 1]} : vector<8x128xf32> to vector<8x32xf32>
    %302 = vector.extract_strided_slice %299 {offsets = [0, 32], sizes = [8, 32], strides = [1, 1]} : vector<8x128xf32> to vector<8x32xf32>
    %303 = vector.extract_strided_slice %300 {offsets = [0, 64], sizes = [8, 32], strides = [1, 1]} : vector<8x128xf32> to vector<8x32xf32>
    %304 = vector.extract_strided_slice %299 {offsets = [0, 96], sizes = [8, 32], strides = [1, 1]} : vector<8x128xf32> to vector<8x32xf32>
    %305 = arith.mulf %302, %268 : vector<8x32xf32>
    %306 = arith.mulf %301, %303 : vector<8x32xf32>
    %307 = arith.addf %305, %306 : vector<8x32xf32>
    %308 = math.tanh %307 : vector<8x32xf32>
    %309 = arith.mulf %304, %308 : vector<8x32xf32>
    %cst_72 = arith.constant dense<0.000000e+00> : vector<8x128xf32>
    %310 = tpu.matmul %309, %10, %cst_72 {dimension_numbers = #tpu.dot_dimension_numbers<[1], [0], [0], [1], [0, 0, 1, 1], [], []>} : vector<8x32xf32>, vector<32x128xf32>, vector<8x128xf32> -> vector<8x128xf32>
    %311 = arith.addf %310, %290 : vector<8x128xf32>
    %312 = arith.addf %311, %14 : vector<8x128xf32>
    %313 = arith.negf %312 : vector<8x128xf32>
    %314 = math.exp %313 : vector<8x128xf32>
    %cst_73 = arith.constant 1.000000e+00 : f32
    %315 = vector.broadcast %cst_73 : f32 to vector<8x128xf32>
    %316 = arith.addf %315, %314 : vector<8x128xf32>
    %317 = arith.divf %315, %316 : vector<8x128xf32>
    %318 = math.tanh %312 : vector<8x128xf32>
    %319 = vector.extract_strided_slice %317 {offsets = [0, 0], sizes = [8, 32], strides = [1, 1]} : vector<8x128xf32> to vector<8x32xf32>
    %320 = vector.extract_strided_slice %317 {offsets = [0, 32], sizes = [8, 32], strides = [1, 1]} : vector<8x128xf32> to vector<8x32xf32>
    %321 = vector.extract_strided_slice %318 {offsets = [0, 64], sizes = [8, 32], strides = [1, 1]} : vector<8x128xf32> to vector<8x32xf32>
    %322 = vector.extract_strided_slice %317 {offsets = [0, 96], sizes = [8, 32], strides = [1, 1]} : vector<8x128xf32> to vector<8x32xf32>
    %323 = arith.mulf %320, %286 : vector<8x32xf32>
    %324 = arith.mulf %319, %321 : vector<8x32xf32>
    %325 = arith.addf %323, %324 : vector<8x32xf32>
    %326 = math.tanh %325 : vector<8x32xf32>
    %327 = arith.mulf %322, %326 : vector<8x32xf32>
    %c8_i32 = arith.constant 8 : i32
    %cst_74 = arith.constant 0.000000e+00 : f32
    %328 = vector.broadcast %cst_74 : f32 to vector<8x32xf32>
    %329 = arith.maximumf %327, %328 : vector<8x32xf32>
    %c0_75 = arith.constant 0 : index
    %c0_76 = arith.constant 0 : index
    %330 = vector.load %arg8[%c0_75, %c0_76] : memref<32x8xf32, #tpu.memory_space<vmem>>, vector<32x8xf32>
    %cst_77 = arith.constant dense<0.000000e+00> : vector<8x8xf32>
    %331 = tpu.matmul %329, %330, %cst_77 {dimension_numbers = #tpu.dot_dimension_numbers<[1], [0], [0], [1], [0, 0, 1, 1], [], []>} : vector<8x32xf32>, vector<32x8xf32>, vector<8x8xf32> -> vector<8x8xf32>
    %c0_78 = arith.constant 0 : index
    %c0_79 = arith.constant 0 : index
    %332 = vector.load %arg9[%c0_78, %c0_79] : memref<1x8xf32, #tpu.memory_space<vmem>>, vector<1x8xf32>
    %333 = vector.broadcast %332 : vector<1x8xf32> to vector<8x8xf32>
    %334 = arith.addf %331, %333 : vector<8x8xf32>
    %c0_80 = arith.constant 0 : index
    %c0_81 = arith.constant 0 : index
    %335 = vector.load %arg10[%c0_80, %c0_81] : memref<8x8xf32, #tpu.memory_space<vmem>>, vector<8x8xf32>
    tpu.vector_store %arg10[%c0_80, %c0_81], %334 {strides = array<i32>} : memref<8x8xf32, #tpu.memory_space<vmem>>, vector<8x8xf32>,
    return
  }
  func.func @transform_0(%arg0: i32) -> (i32, i32, i32) {
    %c0_i32 = arith.constant 0 : i32
    %c0_i32_0 = arith.constant 0 : i32
    %c0_i32_1 = arith.constant 0 : i32
    return %c0_i32, %arg0, %c0_i32_0 : i32, i32, i32
  }
  func.func @transform_1(%arg0: i32) -> (i32, i32) {
    %c0_i32 = arith.constant 0 : i32
    %c0_i32_0 = arith.constant 0 : i32
    %c0_i32_1 = arith.constant 0 : i32
    return %c0_i32, %c0_i32_0 : i32, i32
  }
  func.func @transform_2(%arg0: i32) -> (i32, i32) {
    %c0_i32 = arith.constant 0 : i32
    %c0_i32_0 = arith.constant 0 : i32
    %c0_i32_1 = arith.constant 0 : i32
    return %c0_i32, %c0_i32_0 : i32, i32
  }
  func.func @transform_3(%arg0: i32) -> (i32, i32) {
    %c0_i32 = arith.constant 0 : i32
    %c0_i32_0 = arith.constant 0 : i32
    %c0_i32_1 = arith.constant 0 : i32
    return %c0_i32, %c0_i32_0 : i32, i32
  }
  func.func @transform_4(%arg0: i32) -> (i32, i32) {
    %c0_i32 = arith.constant 0 : i32
    %c0_i32_0 = arith.constant 0 : i32
    %c0_i32_1 = arith.constant 0 : i32
    return %c0_i32, %c0_i32_0 : i32, i32
  }
  func.func @transform_5(%arg0: i32) -> (i32, i32) {
    %c0_i32 = arith.constant 0 : i32
    %c0_i32_0 = arith.constant 0 : i32
    %c0_i32_1 = arith.constant 0 : i32
    return %c0_i32, %c0_i32_0 : i32, i32
  }
  func.func @transform_6(%arg0: i32) -> (i32, i32) {
    %c0_i32 = arith.constant 0 : i32
    %c0_i32_0 = arith.constant 0 : i32
    %c0_i32_1 = arith.constant 0 : i32
    return %c0_i32, %c0_i32_0 : i32, i32
  }
  func.func @transform_7(%arg0: i32) -> (i32, i32) {
    %c0_i32 = arith.constant 0 : i32
    %c0_i32_0 = arith.constant 0 : i32
    %c0_i32_1 = arith.constant 0 : i32
    return %c0_i32, %c0_i32_0 : i32, i32
  }
  func.func @transform_8(%arg0: i32) -> (i32, i32) {
    %c0_i32 = arith.constant 0 : i32
    %c0_i32_0 = arith.constant 0 : i32
    %c0_i32_1 = arith.constant 0 : i32
    return %c0_i32, %c0_i32_0 : i32, i32
  }
  func.func @transform_9(%arg0: i32) -> (i32, i32) {
    %c0_i32 = arith.constant 0 : i32
    %c0_i32_0 = arith.constant 0 : i32
    return %arg0, %c0_i32 : i32, i32
  }
}

</mosaic_0001>

<bundles_post_ra>
// kernel: tpu_custom_call.1
= control target key start
LH: loop header
LB: loop body
LE: loop exit
PB: predicated region body
PF: predicated region fallthrough
CT: control target
= control target key end

     0   :  { %14 = vsyncpa [#allocation4], 0  ;;  %s3879_s0 = inlined_call_operand.hbm [shape: f32[8,8,16], index: 0, kind: input, shape index: {}]   ;;  %s3880_s1 = inlined_call_operand.hbm [shape: f32[16,128], index: 1, kind: input, shape index: {}]   ;;  %s3881_s2 = inlined_call_operand.vmem [shape: f32[1,128], index: 2, kind: input, shape index: {}]   ;;  %s3882_s3 = inlined_call_operand.vmem [shape: f32[32,128], index: 3, kind: input, shape index: {}]   ;;  %s3883_s4 = inlined_call_operand.hbm [shape: f32[32,128], index: 4, kind: input, shape index: {}]   ;;  %s3884_s5 = inlined_call_operand.hbm [shape: f32[32,128], index: 5, kind: input, shape index: {}]   ;;  %s3885_s6 = inlined_call_operand.vmem [shape: f32[1,128], index: 6, kind: input, shape index: {}]   ;;  %s3886_s7 = inlined_call_operand.vmem [shape: f32[32,8], index: 7, kind: input, shape index: {}]   ;;  %s3887_s8 = inlined_call_operand.vmem [shape: f32[1,8], index: 8, kind: input, shape index: {}]   ;;  %s3888_s9 = inlined_call_operand.hbm [shape: f32[8,8], index: 9, kind: output, shape index: {}]  }
   0x1   :  { %15 = vsyncpa [#allocation7], 0 }
   0x2   :  { %16 = vsyncpa [#allocation10], 0 }
   0x3   :  { %17 = vsyncpa [#allocation5], 0  ;;  %s3279_s30 = smov [#allocation6]   ;;  %s3280_s11 = smov [#allocation3]  }
   0x4   :  { %s35_s10 = sshll.u32 %s3279_s30, 4  ;;  %s23_s12 = sshll.u32 %s3280_s11, 4  ;;  %s36_s10 = int_to_ptr.vmem [resolvable:$true] %s35_s10  ;;  %s24_s12 = int_to_ptr.vmem [resolvable:$true] %s23_s12 }
   0x5   :  { %s3179_s13 = scalar_lea.vmem %s36_s10, 256  ;;  %p3184_p1 = scmp.lt.s32.totalorder %s36_s10, %s36_s10 }
   0x6   :  { %p3180_p0 = scmp.ne.s32.totalorder %s36_s10, %s3179_s13  ;;  %p3185_p2 = scmp.lt.s32.totalorder %s3179_s13, %s3179_s13 }
   0x8   :  { %p3186_p3 = por %p3185_p2, %p3184_p1 }
   0xa   :  { %p3187_p4 = pnand %p3186_p3, %p3180_p0 }
   0xc   :  { %3190 = shalt.err (!%p3187_p4)
}
   0xd   :  { %s3281_s14 = smov 128   ;;  %s3282_s15 = smov 8  }
   0xe   :  { %41 = dma.hbm_to_vmem [thread:$0]  %s3880_s1, 256, %s36_s10, [#allocation7], %s3281_s14, %s3281_s14, %s3282_s15  }
   0xf   :  { %s3199_s18 = scalar_lea.vmem %s24_s12, 1024  ;;  %p3204_p6 = scmp.lt.s32.totalorder %s24_s12, %s24_s12 }
  0x10   :  { %p3200_p5 = scmp.ne.s32.totalorder %s24_s12, %s3199_s18  ;;  %p3205_p7 = scmp.lt.s32.totalorder %s3199_s18, %s3199_s18 }
  0x12   :  { %p3206_p8 = por %p3205_p7, %p3204_p6 }
  0x14   :  { %p3207_p9 = pnand %p3206_p8, %p3200_p5 }
  0x16   :  { %3210 = shalt.err (!%p3207_p9)
}
  0x17   :  { %29 = dma.hbm_to_vmem [thread:$0]  %s3879_s0, 1024, %s24_s12, [#allocation4], %s3281_s14, %s3281_s14, %s3282_s15  }
  0x18   :  { %s3283_s21 = smov [#allocation8]   ;;  %s3284_s23 = smov [#allocation9]  }
  0x19   :  { %s51_s22 = sshll.u32 %s3283_s21, 4  ;;  %s63_s24 = sshll.u32 %s3284_s23, 4  ;;  %s52_s22 = int_to_ptr.vmem [resolvable:$true] %s51_s22  ;;  %s64_s24 = int_to_ptr.vmem [resolvable:$true] %s63_s24 }
  0x1a   :  { %s3219_s1 = scalar_lea.vmem %s52_s22, 512  ;;  %p3224_p11 = scmp.lt.s32.totalorder %s52_s22, %s52_s22 }
  0x1b   :  { %p3220_p10 = scmp.ne.s32.totalorder %s52_s22, %s3219_s1  ;;  %p3225_p12 = scmp.lt.s32.totalorder %s3219_s1, %s3219_s1 }
  0x1d   :  { %p3226_p13 = por %p3225_p12, %p3224_p11 }
  0x1f   :  { %p3227_p0 = pnand %p3226_p13, %p3220_p10 }
  0x21   :  { %3230 = shalt.err (!%p3227_p0)
}
  0x22   :  { %57 = dma.hbm_to_vmem [thread:$0]  %s3883_s4, 512, %s52_s22, [#allocation7], %s3281_s14, %s3281_s14, %s3282_s15  }
  0x23   :  { %s3239_s0 = scalar_lea.vmem %s64_s24, 512  ;;  %p3244_p2 = scmp.lt.s32.totalorder %s64_s24, %s64_s24 }
  0x24   :  { %p3240_p1 = scmp.ne.s32.totalorder %s64_s24, %s3239_s0  ;;  %p3245_p3 = scmp.lt.s32.totalorder %s3239_s0, %s3239_s0 }
  0x26   :  { %p3246_p4 = por %p3245_p3, %p3244_p2 }
  0x28   :  { %p3247_p5 = pnand %p3246_p4, %p3240_p1 }
  0x2a   :  { %3250 = shalt.err (!%p3247_p5)
}
  0x2b   :  { %69 = dma.hbm_to_vmem [thread:$0]  %s3884_s5, 512, %s64_s24, [#allocation10], %s3281_s14, %s3281_s14, %s3282_s15  }
  0x2c   :  { %3271 = dma.done.wait [#allocation4], 1024  }
  0x2d   :  { %3272 = vsyncadd [#allocation4], 4294966272 }
  0x2e   :  { %3273 = dma.done.wait [#allocation7], 768  }
  0x2f   :  { %3274 = vsyncadd [#allocation7], 4294966528 }
  0x30   :  { %3275 = dma.done.wait [#allocation10], 512  }
  0x31   :  { %3276 = vsyncadd [#allocation10], 4294966784  ;;  %v3285_v0 = vmov 0.0   ;;  %vm3286_vm0 = vmmov 0   ;;  %v97_v1 = vld [vmem:[#allocation6 + $0x8] sm:$0xff]  ;;  %v3370_v2 = vld [vmem:[%s3882_s3 + $0x18] sm:$0xff] }
  0x32   :  { %2743 = vmatprep.subr.mxu1 %v3285_v0  ;;  %2751 = vmatprep.mubr.msk.f32.mxu1 %vm3286_vm0, %v3285_v0  ;;  %v96_v3 = vld [vmem:[#allocation6] sm:$0xff]  ;;  %v3376_v4 = vld [vmem:[%s3882_s3 + $0x10] sm:$0xff]  ;;  %vm105_vm1 = vcmask 130048   ;;  %v89_v6 = vld [vmem:[#allocation3 + $0x8] sm:$0xff]  ;;  %s3287_s16 = smov 64   ;;  %s3288_s17 = smov 32  }
  0x33   :  { %2727 = vmatprep.subr.mxu0 %v97_v1  ;;  %2744 = vmatpush3.msra.mxu1 %v3370_v2  ;;  %v88_v5 = vld [vmem:[#allocation3] sm:$0xff]  ;;  %v3383_v7 = vld [vmem:[%s3882_s3 + $0x8] sm:$0xff]  ;;  %v90_v27 = vld [vmem:[#allocation3 + $0x10] sm:$0xff]  ;;  %vm262_vm2 = vcmask 261120   ;;  %vm2523_vm3 = vcmask 64512  }
  0x34   :  { %2728 = vmatpush3.msra.mxu0 %v97_v1  ;;  %2745 = vmatprep.subr.mxu1 %v3285_v0  ;;  %v3391_v8 = vld [vmem:[%s3882_s3] sm:$0xff]  ;;  %v3414_v26 = vld [vmem:[#allocation8 + $0x18] sm:$0xff]  ;;  %v91_v29 = vld [vmem:[#allocation3 + $0x18] sm:$0xff] }
  0x35   :  { %2729 = vmatprep.subr.mxu0 %v96_v3  ;;  %2746 = vmatpush3.msra.mxu1 %v3376_v4  ;;  %v3406_v10 = vld [vmem:[%s3881_s2] ss:$0 sm:$0xff]  ;;  %v3416_v28 = vld [vmem:[#allocation9 + $0x18] sm:$0xff]  ;;  %v3428_v33 = vld [vmem:[#allocation9 + $0x8] sm:$0xff] }
  0x36   :  { %2730 = vmatpush3.msra.mxu0 %v96_v3  ;;  %2731 = vmatprep.mubr.msk.f32.mxu0 %vm105_vm1, %v88_v5  ;;  %v3420_v30 = vld [vmem:[#allocation9 + $0x10] sm:$0xff]  ;;  %v93_v34 = vld [vmem:[#allocation3 + $0x28] sm:$0xff]  ;;  %v3434_v35 = vld [vmem:[#allocation9] sm:$0xff] }
  0x37   :  { %2747 = vmatprep.subr.mxu1 %v3285_v0  ;;  %2732 = vmatmul.mubr.msk.f32.vlgmr.msra.gmra.mxu0 %vm105_vm1, %v89_v6  ;;  %v3422_v31 = vld [vmem:[#allocation8 + $0x10] sm:$0xff]  ;;  %v3436_v36 = vld [vmem:[#allocation8 + $0x8] sm:$0xff]  ;;  %v94_v37 = vld [vmem:[#allocation3 + $0x30] sm:$0xff] }
  0x38   :  { %2748 = vmatpush3.msra.mxu1 %v3383_v7  ;;  %2765 = vmatprep.subr.mxu0 %v3285_v0  ;;  %v92_v32 = vld [vmem:[#allocation3 + $0x20] sm:$0xff]  ;;  %v95_v38 = vld [vmem:[#allocation3 + $0x38] sm:$0xff]  ;;  %v3448_v40 = vld [vmem:[#allocation8] sm:$0xff] }
  0x39   :  { %2749 = vmatprep.subr.mxu1 %v3285_v0  ;;  %2766 = vmatpush3.msra.mxu0 %v3414_v26  ;;  %v3506_v53 = vld [vmem:[%s3885_s6] ss:$0 sm:$0xff] }
  0x3a   :  { %2750 = vmatpush3.msra.mxu1 %v3391_v8  ;;  %2734 = vmatprep.mubr.msk.f32.mxu0 %vm105_vm1, %v90_v27 }
  0x3b   :  { %2752 = vmatmul.mubr.f32.vlgmr.msra.gmra.mxu1 %v3285_v0  ;;  %2754 = vmatprep.subr.mxu1 %v3285_v0 }
  0x3c   :  { %2762 = vmatprep.mubr.msk.f32.mxu1 %vm3286_vm0, %v3285_v0  ;;  %2755 = vmatpush3.msra.mxu1 %v3416_v28 }
  0x3d   :  { %2735 = vmatmul.mubr.msk.f32.gmra.mxu0 %vm105_vm1, %v91_v29  ;;  %2756 = vmatprep.subr.mxu1 %v3285_v0 }
  0x3e   :  { %2767 = vmatprep.subr.mxu0 %v3285_v0  ;;  %2757 = vmatpush3.msra.mxu1 %v3420_v30 }
  0x3f   :  { %2768 = vmatpush3.msra.mxu0 %v3422_v31  ;;  %2758 = vmatprep.subr.mxu1 %v3285_v0 }
  0x40   :  { %2737 = vmatprep.mubr.msk.f32.mxu0 %vm105_vm1, %v92_v32  ;;  %2759 = vmatpush3.msra.mxu1 %v3428_v33 }
  0x41   :  { %2738 = vmatmul.mubr.msk.f32.gmra.mxu0 %vm105_vm1, %v93_v34  ;;  %2760 = vmatprep.subr.mxu1 %v3285_v0 }
  0x42   :  { %2769 = vmatprep.subr.mxu0 %v3285_v0  ;;  %2761 = vmatpush3.msra.mxu1 %v3434_v35 }
  0x43   :  { %2770 = vmatpush3.msra.mxu0 %v3436_v36  ;;  %2776 = vmatprep.subr.mxu1 %v3285_v0 }
  0x44   :  { %2740 = vmatprep.mubr.msk.f32.mxu0 %vm105_vm1, %v94_v37  ;;  %2763 = vmatmul.mubr.f32.vlgmr.msra.gmra.mxu1 %v3285_v0 }
  0x45   :  { %2741 = vmatmul.mubr.msk.f32.gmra.mxu0 %vm105_vm1, %v95_v38  ;;  %2777 = vmatpush3.msra.mxu1 %v3370_v2 }
  0x46   :  { %2778 = vmatprep.subr.mxu1 %v3285_v0  ;;  %2771 = vmatprep.subr.mxu0 %v3285_v0 }
  0x47   :  { %2779 = vmatpush3.msra.mxu1 %v3376_v4  ;;  %2772 = vmatpush3.msra.mxu0 %v3448_v40 }
  0x48   :  { %2780 = vmatprep.subr.mxu1 %v3285_v0  ;;  %2773 = vmatprep.mubr.msk.f32.mxu0 %vm3286_vm0, %v3285_v0 }
  0x49   :  { %2781 = vmatpush3.msra.mxu1 %v3383_v7  ;;  %2784 = vmatprep.mubr.msk.f32.mxu1 %vm3286_vm0, %v3285_v0 }
  0x4a   :  { %2782 = vmatprep.subr.mxu1 %v3285_v0  ;;  %2787 = vmatprep.subr.mxu0 %v3285_v0 }
  0x4b   :  { %2783 = vmatpush3.msra.mxu1 %v3391_v8 }
  0x4c   :  { %2798 = vmatprep.subr.mxu1 %v3285_v0 }
  0xf7   :  { %v3401_v9 = vpop.f32.mrf.mxu0 }
  0xf8   :  { %v202_v52 = vadd.f32 %v3401_v9, %v3406_v10 }
  0xf9   :  { %v196_v11 = vpop.f32.mrf.mxu0 }
  0xfa   :  { %v197_v12 = vadd.f32 %v3406_v10, %v196_v11 }
  0xfb   :  { %v332_v13 = vpop.f32.mrf.mxu1 }
  0xfc   :  { %v407_v14 = vadd.f32 %v332_v13, %v197_v12 }
  0xfd   :  { %v2753_v15 = vpop.f32.mrf.mxu1  ;;  %v3489_v46 = vpop.f32.mrf.mxu0 }
  0xfe   :  { %3029 = vtanh.f32 %v407_v14  ;;  %v2552_v17 = vmul.f32 -1.442695, %v407_v14 }
  0xff   :  { %v3491_v47 = vpop.f32.mrf.mxu0 }
 0x100   :  { %3031 = vpow2.f32 %v2552_v17 }
 0x101   :  { %v3493_v48 = vpop.f32.mrf.mxu0 }
 0x103   :  { %v3495_v49 = vpop.f32.mrf.mxu0 }
 0x104   :  { %v402_v43 = vpop.f32.mrf.mxu1 }
 0x105   :  { %v3497_v50 = vpop.f32.mrf.mxu0 }
 0x106   :  { %v2764_v44 = vpop.f32.mrf.mxu1 }
 0x107   :  { %v3499_v51 = vpop.f32.mrf.mxu0 }
 0x10b   :  { %v3030_v16 = vpop.eup %3029 }
 0x10c   :  { %417 = vrot.lane.b32.xlu0 %v3030_v16, %s3287_s16 }
 0x10d   :  { %v3032_v18 = vpop.eup %3031 }
 0x10e   :  { %v411_v19 = vadd.f32 1.0, %v3032_v18 }
 0x110   :  { %3033 = vrcp.f32 %v411_v19 }
 0x11d   :  { %v3034_v20 = vpop.eup %3033 }
 0x11e   :  { %v415_v23 = vmul.f32 0.0, %v3034_v20 }
 0x17e   :  { %v418_v21 = vpop.permute.xlu0 %417 }
 0x17f   :  { %v420_v22 = vmul.f32 %v3034_v20, %v418_v21 }
 0x181   :  { %422 = vrot.lane.b32.xlu0 %v420_v22, %s3288_s17 }
 0x1f3   :  { %v423_v24 = vpop.permute.xlu0 %422 }
 0x1f4   :  { %v3411_v25 = vadd.f32 %v423_v24, %v415_v23 }
 0x1f6   :  { %3035 = vtanh.f32 %v3411_v25 }
 0x203   :  { %v3036_v39 = vpop.eup %3035 }
 0x204   :  { %428 = vrot.lane.b32.xlu1 %v3036_v39, %s3287_s16 }
 0x276   :  { %v429_v41 = vpop.permute.xlu1 %428 }
 0x277   :  { %v431_v42 = vmul.f32 %v3034_v20, %v429_v41 }
 0x279   :  { %433 = vrot.lane.b32.xlu1 %v431_v42, %s3288_s17 }
 0x2eb   :  { %v434_v45 = vpop.permute.xlu1 %433 }
 0x2ec   :  { %2774 = vmatmul.mubr.msk.f32.vlgmr.msra.gmra.mxu0 %vm262_vm2, %v434_v45  ;;  %2785 = vmatmul.mubr.msk.f32.vlgmr.msra.gmra.mxu1 %vm262_vm2, %v434_v45  ;;  %v207_v45 = vadd.f32 %v3406_v10, %v3491_v47 }
 0x2ed   :  { %2799 = vmatpush3.msra.mxu1 %v3414_v26  ;;  %2788 = vmatpush3.msra.mxu0 %v3416_v28 }
 0x2ee   :  { %2800 = vmatprep.subr.mxu1 %v3285_v0  ;;  %2789 = vmatprep.subr.mxu0 %v3285_v0 }
 0x2ef   :  { %2801 = vmatpush3.msra.mxu1 %v3422_v31  ;;  %2790 = vmatpush3.msra.mxu0 %v3420_v30 }
 0x2f0   :  { %2802 = vmatprep.subr.mxu1 %v3285_v0  ;;  %2791 = vmatprep.subr.mxu0 %v3285_v0 }
 0x2f1   :  { %2803 = vmatpush3.msra.mxu1 %v3436_v36  ;;  %2792 = vmatpush3.msra.mxu0 %v3428_v33 }
 0x2f2   :  { %2804 = vmatprep.subr.mxu1 %v3285_v0  ;;  %2806 = vmatprep.mubr.msk.f32.mxu1 %vm3286_vm0, %v3285_v0 }
 0x2f3   :  { %2805 = vmatpush3.msra.mxu1 %v3448_v40  ;;  %2793 = vmatprep.subr.mxu0 %v3285_v0 }
 0x2f4   :  { %2794 = vmatpush3.msra.mxu0 %v3434_v35  ;;  %2795 = vmatprep.mubr.msk.f32.mxu0 %vm3286_vm0, %v3285_v0 }
 0x2f5   :  { %2809 = vmatprep.subr.mxu0 %v3285_v0  ;;  %2820 = vmatprep.subr.mxu1 %v3285_v0 }
 0x3ac   :  { %v503_v54 = vpop.f32.mrf.mxu0  ;;  %v598_v55 = vpop.f32.mrf.mxu1 }
 0x3ad   :  { %v504_v56 = vadd.f32 %v503_v54, %v402_v43  ;;  %v679_v57 = vadd.f32 %v598_v55, %v202_v52 }
 0x3ae   :  { %v2775_v58 = vpop.f32.mrf.mxu0  ;;  %v2786_v59 = vpop.f32.mrf.mxu1 }
 0x3af   :  { %v507_v60 = vadd.f32 %v3506_v53, %v504_v56  ;;  %3037 = vtanh.f32 %v679_v57  ;;  %v2557_v63 = vmul.f32 -1.442695, %v679_v57 }
 0x3b1   :  { %3039 = vtanh.f32 %v507_v60  ;;  %v2554_v1 = vmul.f32 -1.442695, %v507_v60 }
 0x3b2   :  { %3041 = vpow2.f32 %v2557_v63 }
 0x3b3   :  { %3043 = vpow2.f32 %v2554_v1 }
 0x3bc   :  { %v3038_v61 = vpop.eup %3037 }
 0x3bd   :  { %689 = vrot.lane.b32.xlu1 %v3038_v61, %s3287_s16 }
 0x3be   :  { %v3040_v62 = vpop.eup %3039 }
 0x3bf   :  { %517 = vrot.lane.b32.xlu0 %v3040_v62, %s3287_s16  ;;  %v3042_v3 = vpop.eup %3041 }
 0x3c0   :  { %v3044_v5 = vpop.eup %3043  ;;  %v683_v6 = vadd.f32 1.0, %v3042_v3 }
 0x3c1   :  { %v511_v9 = vadd.f32 1.0, %v3044_v5 }
 0x3c2   :  { %3045 = vrcp.f32 %v683_v6 }
 0x3c3   :  { %3047 = vrcp.f32 %v511_v9 }
 0x3cf   :  { %v3046_v11 = vpop.eup %3045 }
 0x3d0   :  { %v3048_v14 = vpop.eup %3047  ;;  %v687_v17 = vmul.f32 %v3046_v11, %v3411_v25 }
 0x3d1   :  { %v515_v20 = vmul.f32 0.0, %v3048_v14 }
 0x42f   :  { %v690_v12 = vpop.permute.xlu1 %689 }
 0x430   :  { %v692_v13 = vmul.f32 %v3046_v11, %v690_v12 }
 0x431   :  { %v518_v15 = vpop.permute.xlu0 %517 }
 0x432   :  { %v520_v16 = vmul.f32 %v3048_v14, %v518_v15  ;;  %694 = vrot.lane.b32.xlu1 %v692_v13, %s3288_s17 }
 0x434   :  { %522 = vrot.lane.b32.xlu0 %v520_v16, %s3288_s17 }
 0x4a4   :  { %v695_v18 = vpop.permute.xlu1 %694 }
 0x4a5   :  { %v3514_v19 = vadd.f32 %v695_v18, %v687_v17 }
 0x4a6   :  { %v523_v21 = vpop.permute.xlu0 %522 }
 0x4a7   :  { %3049 = vtanh.f32 %v3514_v19  ;;  %v3517_v22 = vadd.f32 %v523_v21, %v515_v20 }
 0x4a9   :  { %3051 = vtanh.f32 %v3517_v22 }
 0x4b4   :  { %v3050_v23 = vpop.eup %3049 }
 0x4b5   :  { %700 = vrot.lane.b32.xlu1 %v3050_v23, %s3287_s16 }
 0x4b6   :  { %v3052_v24 = vpop.eup %3051 }
 0x4b7   :  { %528 = vrot.lane.b32.xlu0 %v3052_v24, %s3287_s16 }
 0x527   :  { %v701_v27 = vpop.permute.xlu1 %700 }
 0x528   :  { %v703_v29 = vmul.f32 %v3046_v11, %v701_v27 }
 0x529   :  { %v529_v25 = vpop.permute.xlu0 %528 }
 0x52a   :  { %v531_v32 = vmul.f32 %v3048_v14, %v529_v25  ;;  %705 = vrot.lane.b32.xlu1 %v703_v29, %s3288_s17 }
 0x52c   :  { %603 = vrot.lane.b32.xlu0 %v531_v32, %s3288_s17  ;;  %v212_v32 = vadd.f32 %v3489_v46, %v3406_v10 }
 0x59c   :  { %v706_v34 = vpop.permute.xlu1 %705 }
 0x59d   :  { %2807 = vmatmul.mubr.msk.f32.vlgmr.msra.gmra.mxu1 %vm262_vm2, %v706_v34 }
 0x59e   :  { %v604_v37 = vpop.permute.xlu0 %603  ;;  %2821 = vmatpush3.msra.mxu1 %v3416_v28  ;;  %2828 = vmatprep.mubr.msk.f32.mxu1 %vm3286_vm0, %v3285_v0 }
 0x59f   :  { %2796 = vmatmul.mubr.msk.f32.vlgmr.msra.gmra.mxu0 %vm262_vm2, %v604_v37  ;;  %2822 = vmatprep.subr.mxu1 %v3285_v0 }
 0x5a0   :  { %2810 = vmatpush3.msra.mxu0 %v3370_v2  ;;  %2817 = vmatprep.mubr.msk.f32.mxu0 %vm3286_vm0, %v3285_v0 }
 0x5a1   :  { %2811 = vmatprep.subr.mxu0 %v3285_v0  ;;  %2823 = vmatpush3.msra.mxu1 %v3420_v30 }
 0x5a2   :  { %2812 = vmatpush3.msra.mxu0 %v3376_v4  ;;  %2824 = vmatprep.subr.mxu1 %v3285_v0 }
 0x5a3   :  { %2813 = vmatprep.subr.mxu0 %v3285_v0  ;;  %2825 = vmatpush3.msra.mxu1 %v3428_v33 }
 0x5a4   :  { %2814 = vmatpush3.msra.mxu0 %v3383_v7  ;;  %2826 = vmatprep.subr.mxu1 %v3285_v0 }
 0x5a5   :  { %2815 = vmatprep.subr.mxu0 %v3285_v0  ;;  %2827 = vmatpush3.msra.mxu1 %v3434_v35 }
 0x5a6   :  { %2816 = vmatpush3.msra.mxu0 %v3391_v8  ;;  %2842 = vmatprep.subr.mxu1 %v3285_v0 }
 0x5a7   :  { %2818 = vmatmul.mubr.msk.f32.vlgmr.msra.gmra.mxu0 %vm262_vm2, %v706_v34  ;;  %2831 = vmatprep.subr.mxu0 %v3285_v0 }
 0x5a8   :  { %2832 = vmatpush3.msra.mxu0 %v3414_v26  ;;  %2839 = vmatprep.mubr.msk.f32.mxu0 %vm3286_vm0, %v3285_v0 }
 0x5a9   :  { %2833 = vmatprep.subr.mxu0 %v3285_v0 }
 0x5aa   :  { %2834 = vmatpush3.msra.mxu0 %v3422_v31 }
 0x5ab   :  { %2835 = vmatprep.subr.mxu0 %v3285_v0 }
 0x5ac   :  { %2836 = vmatpush3.msra.mxu0 %v3436_v36 }
 0x5ad   :  { %2837 = vmatprep.subr.mxu0 %v3285_v0 }
 0x5ae   :  { %2838 = vmatpush3.msra.mxu0 %v3448_v40 }
 0x5af   :  { %2853 = vmatprep.subr.mxu0 %v3285_v0 }
 0x65d   :  { %v775_v38 = vpop.f32.mrf.mxu1 }
 0x65f   :  { %v673_v39 = vpop.f32.mrf.mxu0  ;;  %v2808_v41 = vpop.f32.mrf.mxu1 }
 0x660   :  { %v776_v42 = vadd.f32 %v775_v38, %v673_v39 }
 0x661   :  { %v2797_v43 = vpop.f32.mrf.mxu0 }
 0x662   :  { %v779_v44 = vadd.f32 %v3506_v53, %v776_v42 }
 0x664   :  { %3053 = vtanh.f32 %v779_v44  ;;  %v2559_v58 = vmul.f32 -1.442695, %v779_v44 }
 0x667   :  { %v870_v52 = vpop.f32.mrf.mxu0 }
 0x668   :  { %v951_v54 = vadd.f32 %v870_v52, %v207_v45 }
 0x669   :  { %v2819_v55 = vpop.f32.mrf.mxu0 }
 0x66a   :  { %3055 = vtanh.f32 %v951_v54  ;;  %v2562_v59 = vmul.f32 -1.442695, %v951_v54 }
 0x66b   :  { %3057 = vpow2.f32 %v2559_v58 }
 0x66c   :  { %3059 = vpow2.f32 %v2562_v59 }
 0x671   :  { %v3054_v56 = vpop.eup %3053 }
 0x672   :  { %789 = vrot.lane.b32.xlu0 %v3054_v56, %s3287_s16 }
 0x677   :  { %v3056_v57 = vpop.eup %3055 }
 0x678   :  { %961 = vrot.lane.b32.xlu1 %v3056_v57, %s3287_s16  ;;  %v3058_v60 = vpop.eup %3057 }
 0x679   :  { %v783_v61 = vadd.f32 1.0, %v3058_v60  ;;  %v3060_v62 = vpop.eup %3059 }
 0x67a   :  { %v955_v63 = vadd.f32 1.0, %v3060_v62 }
 0x67b   :  { %3061 = vrcp.f32 %v783_v61 }
 0x67c   :  { %3063 = vrcp.f32 %v955_v63 }
 0x688   :  { %v3062_v47 = vpop.eup %3061 }
 0x689   :  { %v3064_v5 = vpop.eup %3063  ;;  %v787_v11 = vmul.f32 %v3062_v47, %v3517_v22 }
 0x68a   :  { %v959_v14 = vmul.f32 %v3064_v5, %v3514_v19 }
 0x6e4   :  { %v790_v1 = vpop.permute.xlu0 %789 }
 0x6e5   :  { %v792_v3 = vmul.f32 %v3062_v47, %v790_v1 }
 0x6e7   :  { %794 = vrot.lane.b32.xlu0 %v792_v3, %s3288_s17 }
 0x6ea   :  { %v962_v6 = vpop.permute.xlu1 %961 }
 0x6eb   :  { %v964_v9 = vmul.f32 %v3064_v5, %v962_v6 }
 0x6ed   :  { %966 = vrot.lane.b32.xlu1 %v964_v9, %s3288_s17 }
 0x759   :  { %v795_v12 = vpop.permute.xlu0 %794 }
 0x75a   :  { %v3565_v13 = vadd.f32 %v795_v12, %v787_v11 }
 0x75c   :  { %3065 = vtanh.f32 %v3565_v13 }
 0x75f   :  { %v967_v15 = vpop.permute.xlu1 %966 }
 0x760   :  { %v3569_v16 = vadd.f32 %v967_v15, %v959_v14 }
 0x762   :  { %3067 = vtanh.f32 %v3569_v16 }
 0x769   :  { %v3066_v17 = vpop.eup %3065 }
 0x76a   :  { %800 = vrot.lane.b32.xlu0 %v3066_v17, %s3287_s16 }
 0x76f   :  { %v3068_v18 = vpop.eup %3067 }
 0x770   :  { %972 = vrot.lane.b32.xlu1 %v3068_v18, %s3287_s16 }
 0x7dc   :  { %v801_v20 = vpop.permute.xlu0 %800 }
 0x7dd   :  { %v803_v21 = vmul.f32 %v3062_v47, %v801_v20 }
 0x7df   :  { %875 = vrot.lane.b32.xlu0 %v803_v21, %s3288_s17 }
 0x7e2   :  { %v973_v22 = vpop.permute.xlu1 %972 }
 0x7e3   :  { %v975_v23 = vmul.f32 %v3064_v5, %v973_v22 }
 0x7e5   :  { %977 = vrot.lane.b32.xlu1 %v975_v23, %s3288_s17 }
 0x851   :  { %v876_v19 = vpop.permute.xlu0 %875 }
 0x852   :  { %2829 = vmatmul.mubr.msk.f32.vlgmr.msra.gmra.mxu1 %vm262_vm2, %v876_v19 }
 0x853   :  { %2843 = vmatpush3.msra.mxu1 %v3370_v2  ;;  %2850 = vmatprep.mubr.msk.f32.mxu1 %vm3286_vm0, %v3285_v0 }
 0x854   :  { %2844 = vmatprep.subr.mxu1 %v3285_v0 }
 0x855   :  { %2845 = vmatpush3.msra.mxu1 %v3376_v4 }
 0x856   :  { %2846 = vmatprep.subr.mxu1 %v3285_v0 }
 0x857   :  { %2847 = vmatpush3.msra.mxu1 %v3383_v7  ;;  %v978_v24 = vpop.permute.xlu1 %977 }
 0x858   :  { %2840 = vmatmul.mubr.msk.f32.vlgmr.msra.gmra.mxu0 %vm262_vm2, %v978_v24  ;;  %2848 = vmatprep.subr.mxu1 %v3285_v0 }
 0x859   :  { %2849 = vmatpush3.msra.mxu1 %v3391_v8  ;;  %2854 = vmatpush3.msra.mxu0 %v3416_v28 }
 0x85a   :  { %2851 = vmatmul.mubr.msk.f32.vlgmr.msra.gmra.mxu1 %vm262_vm2, %v978_v24  ;;  %2864 = vmatprep.subr.mxu1 %v3285_v0  ;;  %v217_v24 = vadd.f32 %v3406_v10, %v3495_v49 }
 0x85b   :  { %2855 = vmatprep.subr.mxu0 %v3285_v0  ;;  %2865 = vmatpush3.msra.mxu1 %v3414_v26 }
 0x85c   :  { %2856 = vmatpush3.msra.mxu0 %v3420_v30  ;;  %2866 = vmatprep.subr.mxu1 %v3285_v0 }
 0x85d   :  { %2857 = vmatprep.subr.mxu0 %v3285_v0  ;;  %2867 = vmatpush3.msra.mxu1 %v3422_v31 }
 0x85e   :  { %2858 = vmatpush3.msra.mxu0 %v3428_v33  ;;  %2868 = vmatprep.subr.mxu1 %v3285_v0 }
 0x85f   :  { %2859 = vmatprep.subr.mxu0 %v3285_v0  ;;  %2869 = vmatpush3.msra.mxu1 %v3436_v36 }
 0x860   :  { %2860 = vmatpush3.msra.mxu0 %v3434_v35  ;;  %2870 = vmatprep.subr.mxu1 %v3285_v0 }
 0x861   :  { %2871 = vmatpush3.msra.mxu1 %v3448_v40  ;;  %2872 = vmatprep.mubr.msk.f32.mxu1 %vm3286_vm0, %v3285_v0 }
 0x862   :  { %2861 = vmatprep.mubr.msk.f32.mxu0 %vm3286_vm0, %v3285_v0  ;;  %2875 = vmatprep.subr.mxu0 %v3285_v0 }
 0x863   :  { %2886 = vmatprep.subr.mxu1 %v3285_v0 }
 0x912   :  { %v945_v27 = vpop.f32.mrf.mxu1 }
 0x914   :  { %v2830_v29 = vpop.f32.mrf.mxu1 }
 0x918   :  { %v1047_v25 = vpop.f32.mrf.mxu0 }
 0x919   :  { %v1048_v34 = vadd.f32 %v1047_v25, %v945_v27 }
 0x91a   :  { %v2841_v37 = vpop.f32.mrf.mxu0  ;;  %v1142_v38 = vpop.f32.mrf.mxu1 }
 0x91b   :  { %v1051_v39 = vadd.f32 %v3506_v53, %v1048_v34  ;;  %v1223_v41 = vadd.f32 %v1142_v38, %v212_v32 }
 0x91c   :  { %v2852_v42 = vpop.f32.mrf.mxu1 }
 0x91d   :  { %3069 = vtanh.f32 %v1051_v39  ;;  %v2564_v45 = vmul.f32 -1.442695, %v1051_v39  ;;  %v2567_v52 = vmul.f32 -1.442695, %v1223_v41 }
 0x91e   :  { %3071 = vtanh.f32 %v1223_v41 }
 0x91f   :  { %3073 = vpow2.f32 %v2564_v45 }
 0x920   :  { %3075 = vpow2.f32 %v2567_v52 }
 0x92a   :  { %v3070_v43 = vpop.eup %3069 }
 0x92b   :  { %v3072_v44 = vpop.eup %3071  ;;  %1061 = vrot.lane.b32.xlu0 %v3070_v43, %s3287_s16 }
 0x92c   :  { %1233 = vrot.lane.b32.xlu1 %v3072_v44, %s3287_s16  ;;  %v3074_v46 = vpop.eup %3073 }
 0x92d   :  { %v3076_v54 = vpop.eup %3075  ;;  %v1055_v55 = vadd.f32 1.0, %v3074_v46 }
 0x92e   :  { %v1227_v56 = vadd.f32 1.0, %v3076_v54 }
 0x92f   :  { %3077 = vrcp.f32 %v1055_v55 }
 0x930   :  { %3079 = vrcp.f32 %v1227_v56 }
 0x93c   :  { %v3078_v57 = vpop.eup %3077 }
 0x93d   :  { %v3080_v59 = vpop.eup %3079  ;;  %v1059_v63 = vmul.f32 %v3078_v57, %v3565_v13 }
 0x93e   :  { %v1231_v47 = vmul.f32 %v3080_v59, %v3569_v16 }
 0x99d   :  { %v1062_v58 = vpop.permute.xlu0 %1061 }
 0x99e   :  { %v1234_v60 = vpop.permute.xlu1 %1233  ;;  %v1064_v61 = vmul.f32 %v3078_v57, %v1062_v58 }
 0x99f   :  { %v1236_v62 = vmul.f32 %v3080_v59, %v1234_v60 }
 0x9a0   :  { %1066 = vrot.lane.b32.xlu0 %v1064_v61, %s3288_s17 }
 0x9a1   :  { %1238 = vrot.lane.b32.xlu1 %v1236_v62, %s3288_s17 }
 0xa12   :  { %v1067_v1 = vpop.permute.xlu0 %1066 }
 0xa13   :  { %v1239_v3 = vpop.permute.xlu1 %1238  ;;  %v3618_v5 = vadd.f32 %v1067_v1, %v1059_v63 }
 0xa14   :  { %v3620_v6 = vadd.f32 %v1239_v3, %v1231_v47 }
 0xa15   :  { %3081 = vtanh.f32 %v3618_v5 }
 0xa16   :  { %3083 = vtanh.f32 %v3620_v6 }
 0xa22   :  { %v3082_v9 = vpop.eup %3081 }
 0xa23   :  { %v3084_v11 = vpop.eup %3083  ;;  %1072 = vrot.lane.b32.xlu0 %v3082_v9, %s3287_s16  ;;  %v222_v9 = vadd.f32 %v3493_v48, %v3406_v10 }
 0xa24   :  { %1244 = vrot.lane.b32.xlu1 %v3084_v11, %s3287_s16 }
 0xa95   :  { %v1073_v12 = vpop.permute.xlu0 %1072 }
 0xa96   :  { %v1245_v13 = vpop.permute.xlu1 %1244  ;;  %v1075_v14 = vmul.f32 %v3078_v57, %v1073_v12 }
 0xa97   :  { %v1247_v15 = vmul.f32 %v3080_v59, %v1245_v13 }
 0xa98   :  { %1147 = vrot.lane.b32.xlu0 %v1075_v14, %s3288_s17 }
 0xa99   :  { %1249 = vrot.lane.b32.xlu1 %v1247_v15, %s3288_s17 }
 0xb0a   :  { %v1148_v16 = vpop.permute.xlu0 %1147 }
 0xb0b   :  { %v1250_v17 = vpop.permute.xlu1 %1249  ;;  %2862 = vmatmul.mubr.msk.f32.vlgmr.msra.gmra.mxu0 %vm262_vm2, %v1148_v16 }
 0xb0c   :  { %2873 = vmatmul.mubr.msk.f32.vlgmr.msra.gmra.mxu1 %vm262_vm2, %v1250_v17  ;;  %2876 = vmatpush3.msra.mxu0 %v3370_v2 }
 0xb0d   :  { %2877 = vmatprep.subr.mxu0 %v3285_v0  ;;  %2883 = vmatprep.mubr.msk.f32.mxu0 %vm3286_vm0, %v3285_v0 }
 0xb0e   :  { %2878 = vmatpush3.msra.mxu0 %v3376_v4  ;;  %2887 = vmatpush3.msra.mxu1 %v3416_v28 }
 0xb0f   :  { %2879 = vmatprep.subr.mxu0 %v3285_v0  ;;  %2888 = vmatprep.subr.mxu1 %v3285_v0 }
 0xb10   :  { %2880 = vmatpush3.msra.mxu0 %v3383_v7  ;;  %2889 = vmatpush3.msra.mxu1 %v3420_v30 }
 0xb11   :  { %2881 = vmatprep.subr.mxu0 %v3285_v0  ;;  %2890 = vmatprep.subr.mxu1 %v3285_v0 }
 0xb12   :  { %2882 = vmatpush3.msra.mxu0 %v3391_v8  ;;  %2891 = vmatpush3.msra.mxu1 %v3428_v33 }
 0xb13   :  { %2884 = vmatmul.mubr.msk.f32.vlgmr.msra.gmra.mxu0 %vm262_vm2, %v1250_v17  ;;  %2892 = vmatprep.subr.mxu1 %v3285_v0 }
 0xb14   :  { %2897 = vmatprep.subr.mxu0 %v3285_v0  ;;  %2893 = vmatpush3.msra.mxu1 %v3434_v35 }
 0xb15   :  { %2898 = vmatpush3.msra.mxu0 %v3414_v26  ;;  %2894 = vmatprep.mubr.msk.f32.mxu1 %vm3286_vm0, %v3285_v0 }
 0xb16   :  { %2899 = vmatprep.subr.mxu0 %v3285_v0  ;;  %2908 = vmatprep.subr.mxu1 %v3285_v0 }
 0xb17   :  { %2900 = vmatpush3.msra.mxu0 %v3422_v31  ;;  %2905 = vmatprep.mubr.msk.f32.mxu0 %vm3286_vm0, %v3285_v0 }
 0xb18   :  { %2901 = vmatprep.subr.mxu0 %v3285_v0 }
 0xb19   :  { %2902 = vmatpush3.msra.mxu0 %v3436_v36 }
 0xb1a   :  { %2903 = vmatprep.subr.mxu0 %v3285_v0 }
 0xb1b   :  { %2904 = vmatpush3.msra.mxu0 %v3448_v40 }
 0xb1c   :  { %2919 = vmatprep.subr.mxu0 %v3285_v0 }
 0xbcb   :  { %v1217_v18 = vpop.f32.mrf.mxu0 }
 0xbcc   :  { %v1319_v20 = vpop.f32.mrf.mxu1 }
 0xbcd   :  { %v1320_v21 = vadd.f32 %v1319_v20, %v1217_v18  ;;  %v2863_v22 = vpop.f32.mrf.mxu0 }
 0xbce   :  { %v2874_v23 = vpop.f32.mrf.mxu1 }
 0xbcf   :  { %v1323_v19 = vadd.f32 %v3506_v53, %v1320_v21 }
 0xbd1   :  { %3085 = vtanh.f32 %v1323_v19  ;;  %v2569_v37 = vmul.f32 -1.442695, %v1323_v19 }
 0xbd3   :  { %v1414_v27 = vpop.f32.mrf.mxu0 }
 0xbd4   :  { %v1495_v29 = vadd.f32 %v1414_v27, %v217_v24 }
 0xbd5   :  { %v2885_v25 = vpop.f32.mrf.mxu0 }
 0xbd6   :  { %3087 = vtanh.f32 %v1495_v29  ;;  %v2572_v38 = vmul.f32 -1.442695, %v1495_v29 }
 0xbd7   :  { %3089 = vpow2.f32 %v2569_v37 }
 0xbd8   :  { %3091 = vpow2.f32 %v2572_v38 }
 0xbde   :  { %v3086_v32 = vpop.eup %3085 }
 0xbdf   :  { %1333 = vrot.lane.b32.xlu0 %v3086_v32, %s3287_s16 }
 0xbe3   :  { %v3088_v34 = vpop.eup %3087 }
 0xbe4   :  { %1505 = vrot.lane.b32.xlu1 %v3088_v34, %s3287_s16  ;;  %v3090_v39 = vpop.eup %3089 }
 0xbe5   :  { %v1327_v41 = vadd.f32 1.0, %v3090_v39  ;;  %v3092_v42 = vpop.eup %3091 }
 0xbe6   :  { %v1499_v43 = vadd.f32 1.0, %v3092_v42 }
 0xbe7   :  { %3093 = vrcp.f32 %v1327_v41 }
 0xbe8   :  { %3095 = vrcp.f32 %v1499_v43 }
 0xbf4   :  { %v3094_v49 = vpop.eup %3093 }
 0xbf5   :  { %v3096_v52 = vpop.eup %3095  ;;  %v1331_v55 = vmul.f32 %v3094_v49, %v3618_v5 }
 0xbf6   :  { %v1503_v58 = vmul.f32 %v3096_v52, %v3620_v6 }
 0xc51   :  { %v1334_v44 = vpop.permute.xlu0 %1333 }
 0xc52   :  { %v1336_v45 = vmul.f32 %v3094_v49, %v1334_v44 }
 0xc54   :  { %1338 = vrot.lane.b32.xlu0 %v1336_v45, %s3288_s17 }
 0xc56   :  { %v1506_v46 = vpop.permute.xlu1 %1505 }
 0xc57   :  { %v1508_v54 = vmul.f32 %v3096_v52, %v1506_v46 }
 0xc59   :  { %1510 = vrot.lane.b32.xlu1 %v1508_v54, %s3288_s17 }
 0xcc6   :  { %v1339_v56 = vpop.permute.xlu0 %1338 }
 0xcc7   :  { %v3669_v57 = vadd.f32 %v1339_v56, %v1331_v55  ;;  %v3737_v55 = vld [vmem:[%s3882_s3 + $0x18] sm:$0xff]  ;;  %v3746_v56 = vld [vmem:[%s3882_s3 + $0x10] sm:$0xff] }
 0xcc9   :  { %3097 = vtanh.f32 %v3669_v57 }
 0xccb   :  { %v1511_v59 = vpop.permute.xlu1 %1510 }
 0xccc   :  { %v3673_v60 = vadd.f32 %v1511_v59, %v1503_v58  ;;  %v3789_v59 = vld [vmem:[%s3881_s2] ss:$0 sm:$0xff] }
 0xcce   :  { %3099 = vtanh.f32 %v3673_v60 }
 0xcd6   :  { %v3098_v61 = vpop.eup %3097 }
 0xcd7   :  { %1344 = vrot.lane.b32.xlu0 %v3098_v61, %s3287_s16 }
 0xcdb   :  { %v3100_v62 = vpop.eup %3099 }
 0xcdc   :  { %1516 = vrot.lane.b32.xlu1 %v3100_v62, %s3287_s16 }
 0xd49   :  { %v1345_v63 = vpop.permute.xlu0 %1344 }
 0xd4a   :  { %v1347_v47 = vmul.f32 %v3094_v49, %v1345_v63 }
 0xd4c   :  { %1419 = vrot.lane.b32.xlu0 %v1347_v47, %s3288_s17 }
 0xd4e   :  { %v1517_v1 = vpop.permute.xlu1 %1516 }
 0xd4f   :  { %v1519_v3 = vmul.f32 %v3096_v52, %v1517_v1 }
 0xd51   :  { %1521 = vrot.lane.b32.xlu1 %v1519_v3, %s3288_s17 }
 0xdbe   :  { %v1420_v5 = vpop.permute.xlu0 %1419 }
 0xdbf   :  { %2895 = vmatmul.mubr.msk.f32.vlgmr.msra.gmra.mxu1 %vm262_vm2, %v1420_v5 }
 0xdc0   :  { %2909 = vmatpush3.msra.mxu1 %v3370_v2  ;;  %2916 = vmatprep.mubr.msk.f32.mxu1 %vm3286_vm0, %v3285_v0 }
 0xdc1   :  { %2910 = vmatprep.subr.mxu1 %v3285_v0 }
 0xdc2   :  { %2911 = vmatpush3.msra.mxu1 %v3376_v4 }
 0xdc3   :  { %2912 = vmatprep.subr.mxu1 %v3285_v0  ;;  %v1522_v6 = vpop.permute.xlu1 %1521 }
 0xdc4   :  { %2913 = vmatpush3.msra.mxu1 %v3383_v7  ;;  %2906 = vmatmul.mubr.msk.f32.vlgmr.msra.gmra.mxu0 %vm262_vm2, %v1522_v6 }
 0xdc5   :  { %2914 = vmatprep.subr.mxu1 %v3285_v0  ;;  %2920 = vmatpush3.msra.mxu0 %v3416_v28 }
 0xdc6   :  { %2915 = vmatpush3.msra.mxu1 %v3391_v8  ;;  %2921 = vmatprep.subr.mxu0 %v3285_v0 }
 0xdc7   :  { %2917 = vmatmul.mubr.msk.f32.vlgmr.msra.gmra.mxu1 %vm262_vm2, %v1522_v6  ;;  %2930 = vmatprep.subr.mxu1 %v3285_v0 }
 0xdc8   :  { %2931 = vmatpush3.msra.mxu1 %v3414_v26  ;;  %2922 = vmatpush3.msra.mxu0 %v3420_v30 }
 0xdc9   :  { %2932 = vmatprep.subr.mxu1 %v3285_v0  ;;  %2923 = vmatprep.subr.mxu0 %v3285_v0 }
 0xdca   :  { %2933 = vmatpush3.msra.mxu1 %v3422_v31  ;;  %2924 = vmatpush3.msra.mxu0 %v3428_v33 }
 0xdcb   :  { %2934 = vmatprep.subr.mxu1 %v3285_v0  ;;  %2925 = vmatprep.subr.mxu0 %v3285_v0 }
 0xdcc   :  { %2935 = vmatpush3.msra.mxu1 %v3436_v36  ;;  %2926 = vmatpush3.msra.mxu0 %v3434_v35 }
 0xdcd   :  { %2936 = vmatprep.subr.mxu1 %v3285_v0  ;;  %2938 = vmatprep.mubr.msk.f32.mxu1 %vm3286_vm0, %v3285_v0 }
 0xdce   :  { %2937 = vmatpush3.msra.mxu1 %v3448_v40  ;;  %2927 = vmatprep.mubr.msk.f32.mxu0 %vm3286_vm0, %v3285_v0 }
 0xdcf   :  { %2941 = vmatprep.subr.mxu0 %v3285_v0  ;;  %2952 = vmatprep.subr.mxu1 %v3285_v0 }
 0xe7f   :  { %v1489_v2 = vpop.f32.mrf.mxu1 }
 0xe81   :  { %v2896_v4 = vpop.f32.mrf.mxu1 }
 0xe84   :  { %v1591_v7 = vpop.f32.mrf.mxu0 }
 0xe85   :  { %v1592_v8 = vadd.f32 %v1591_v7, %v1489_v2 }
 0xe86   :  { %v2907_v11 = vpop.f32.mrf.mxu0 }
 0xe87   :  { %v1595_v12 = vadd.f32 %v3506_v53, %v1592_v8  ;;  %v1686_v13 = vpop.f32.mrf.mxu1 }
 0xe88   :  { %v1767_v14 = vadd.f32 %v1686_v13, %v222_v9 }
 0xe89   :  { %3101 = vtanh.f32 %v1595_v12  ;;  %v2918_v15 = vpop.f32.mrf.mxu1  ;;  %v2574_v18 = vmul.f32 -1.442695, %v1595_v12 }
 0xe8a   :  { %3103 = vtanh.f32 %v1767_v14  ;;  %v2577_v20 = vmul.f32 -1.442695, %v1767_v14 }
 0xe8b   :  { %3105 = vpow2.f32 %v2574_v18 }
 0xe8c   :  { %3107 = vpow2.f32 %v2577_v20 }
 0xe96   :  { %v3102_v16 = vpop.eup %3101 }
 0xe97   :  { %v3104_v17 = vpop.eup %3103  ;;  %1605 = vrot.lane.b32.xlu0 %v3102_v16, %s3287_s16 }
 0xe98   :  { %1777 = vrot.lane.b32.xlu1 %v3104_v17, %s3287_s16  ;;  %v3106_v21 = vpop.eup %3105 }
 0xe99   :  { %v3108_v10 = vpop.eup %3107  ;;  %v1599_v48 = vadd.f32 1.0, %v3106_v21 }
 0xe9a   :  { %v1771_v22 = vadd.f32 1.0, %v3108_v10 }
 0xe9b   :  { %3109 = vrcp.f32 %v1599_v48 }
 0xe9c   :  { %3111 = vrcp.f32 %v1771_v22 }
 0xea8   :  { %v3110_v23 = vpop.eup %3109 }
 0xea9   :  { %v3112_v24 = vpop.eup %3111  ;;  %v1603_v32 = vmul.f32 %v3110_v23, %v3669_v57  ;;  %v3755_v57 = vld [vmem:[%s3882_s3 + $0x8] sm:$0xff] }
 0xeaa   :  { %v1775_v34 = vmul.f32 %v3112_v24, %v3673_v60 }
 0xf09   :  { %v1606_v19 = vpop.permute.xlu0 %1605 }
 0xf0a   :  { %v1778_v27 = vpop.permute.xlu1 %1777  ;;  %v1608_v29 = vmul.f32 %v3110_v23, %v1606_v19 }
 0xf0b   :  { %v1780_v25 = vmul.f32 %v3112_v24, %v1778_v27  ;;  %v3163_v27 = vld [vmem:[#allocation8 + $0x18] sm:$0xff] }
 0xf0c   :  { %1610 = vrot.lane.b32.xlu0 %v1608_v29, %s3288_s17  ;;  %v3164_v29 = vld [vmem:[#allocation9 + $0x10] sm:$0xff] }
 0xf0d   :  { %1782 = vrot.lane.b32.xlu1 %v1780_v25, %s3288_s17  ;;  %v3165_v25 = vld [vmem:[#allocation8 + $0x10] sm:$0xff] }
 0xf7e   :  { %v1611_v37 = vpop.permute.xlu0 %1610 }
 0xf7f   :  { %v1783_v38 = vpop.permute.xlu1 %1782  ;;  %v3722_v39 = vadd.f32 %v1611_v37, %v1603_v32  ;;  %v3166_v32 = vld [vmem:[#allocation9 + $0x8] sm:$0xff]  ;;  %v3168_v37 = vld [vmem:[#allocation9] sm:$0xff] }
 0xf80   :  { %v3724_v41 = vadd.f32 %v1783_v38, %v1775_v34  ;;  %v3167_v34 = vld [vmem:[#allocation8 + $0x8] sm:$0xff]  ;;  %v3169_v38 = vld [vmem:[#allocation8] sm:$0xff] }
 0xf81   :  { %3113 = vtanh.f32 %v3722_v39 }
 0xf82   :  { %3115 = vtanh.f32 %v3724_v41 }
 0xf8e   :  { %v3114_v42 = vpop.eup %3113 }
 0xf8f   :  { %v3116_v43 = vpop.eup %3115  ;;  %1616 = vrot.lane.b32.xlu0 %v3114_v42, %s3287_s16 }
 0xf90   :  { %1788 = vrot.lane.b32.xlu1 %v3116_v43, %s3287_s16 }
0x1001   :  { %v1617_v49 = vpop.permute.xlu0 %1616 }
0x1002   :  { %v1789_v44 = vpop.permute.xlu1 %1788  ;;  %v1619_v45 = vmul.f32 %v3110_v23, %v1617_v49  ;;  %v232_v49 = vadd.f32 %v3789_v59, %v3497_v50 }
0x1003   :  { %v1791_v52 = vmul.f32 %v3112_v24, %v1789_v44  ;;  %v3162_v24 = vld [vmem:[#allocation9 + $0x18] sm:$0xff] }
0x1004   :  { %1691 = vrot.lane.b32.xlu0 %v1619_v45, %s3288_s17 }
0x1005   :  { %1793 = vrot.lane.b32.xlu1 %v1791_v52, %s3288_s17 }
0x1076   :  { %v1692_v46 = vpop.permute.xlu0 %1691 }
0x1077   :  { %v1794_v54 = vpop.permute.xlu1 %1793  ;;  %2928 = vmatmul.mubr.msk.f32.vlgmr.msra.gmra.mxu0 %vm262_vm2, %v1692_v46 }
0x1078   :  { %2939 = vmatmul.mubr.msk.f32.vlgmr.msra.gmra.mxu1 %vm262_vm2, %v1794_v54  ;;  %2942 = vmatpush3.msra.mxu0 %v3737_v55 }
0x1079   :  { %2943 = vmatprep.subr.mxu0 %v3285_v0  ;;  %2949 = vmatprep.mubr.msk.f32.mxu0 %vm3286_vm0, %v3285_v0 }
0x107a   :  { %2944 = vmatpush3.msra.mxu0 %v3746_v56  ;;  %2953 = vmatpush3.msra.mxu1 %v3416_v28  ;;  %v3764_v28 = vld [vmem:[%s3882_s3] sm:$0xff] }
0x107b   :  { %2945 = vmatprep.subr.mxu0 %v3285_v0  ;;  %2954 = vmatprep.subr.mxu1 %v3285_v0 }
0x107c   :  { %2946 = vmatpush3.msra.mxu0 %v3755_v57  ;;  %2955 = vmatpush3.msra.mxu1 %v3420_v30 }
0x107d   :  { %2947 = vmatprep.subr.mxu0 %v3285_v0  ;;  %2956 = vmatprep.subr.mxu1 %v3285_v0 }
0x107e   :  { %2948 = vmatpush3.msra.mxu0 %v3764_v28  ;;  %2957 = vmatpush3.msra.mxu1 %v3428_v33 }
0x107f   :  { %2950 = vmatmul.mubr.msk.f32.vlgmr.msra.gmra.mxu0 %vm262_vm2, %v1794_v54  ;;  %2958 = vmatprep.subr.mxu1 %v3285_v0 }
0x1080   :  { %2963 = vmatprep.subr.mxu0 %v3285_v0  ;;  %2959 = vmatpush3.msra.mxu1 %v3434_v35 }
0x1081   :  { %2964 = vmatpush3.msra.mxu0 %v3414_v26  ;;  %2960 = vmatprep.mubr.msk.f32.mxu1 %vm3286_vm0, %v3285_v0 }
0x1082   :  { %2965 = vmatprep.subr.mxu0 %v3285_v0  ;;  %2974 = vmatprep.subr.mxu1 %v3285_v0 }
0x1083   :  { %2966 = vmatpush3.msra.mxu0 %v3422_v31  ;;  %2971 = vmatprep.mubr.msk.f32.mxu0 %vm3286_vm0, %v3285_v0 }
0x1084   :  { %2967 = vmatprep.subr.mxu0 %v3285_v0 }
0x1085   :  { %2968 = vmatpush3.msra.mxu0 %v3436_v36  ;;  %v227_v36 = vadd.f32 %v3789_v59, %v3499_v51 }
0x1086   :  { %2969 = vmatprep.subr.mxu0 %v3285_v0 }
0x1087   :  { %2970 = vmatpush3.msra.mxu0 %v3448_v40 }
0x1088   :  { %2985 = vmatprep.subr.mxu0 %v3285_v0 }
0x1137   :  { %v1761_v26 = vpop.f32.mrf.mxu0 }
0x1138   :  { %v1863_v30 = vpop.f32.mrf.mxu1 }
0x1139   :  { %v1864_v33 = vadd.f32 %v1863_v30, %v1761_v26  ;;  %v2929_v35 = vpop.f32.mrf.mxu0 }
0x113a   :  { %v2940_v58 = vpop.f32.mrf.mxu1 }
0x113b   :  { %v1867_v31 = vadd.f32 %v3506_v53, %v1864_v33 }
0x113d   :  { %3117 = vtanh.f32 %v1867_v31  ;;  %v2579_v47 = vmul.f32 -1.442695, %v1867_v31 }
0x113f   :  { %v1958_v60 = vpop.f32.mrf.mxu0 }
0x1140   :  { %v2039_v40 = vadd.f32 %v1958_v60, %v227_v36 }
0x1141   :  { %v2951_v61 = vpop.f32.mrf.mxu0 }
0x1142   :  { %3119 = vtanh.f32 %v2039_v40  ;;  %v2582_v1 = vmul.f32 -1.442695, %v2039_v40 }
0x1143   :  { %3121 = vpow2.f32 %v2579_v47 }
0x1144   :  { %3123 = vpow2.f32 %v2582_v1 }
0x114a   :  { %v3118_v62 = vpop.eup %3117 }
0x114b   :  { %1877 = vrot.lane.b32.xlu0 %v3118_v62, %s3287_s16 }
0x114f   :  { %v3120_v63 = vpop.eup %3119 }
0x1150   :  { %2049 = vrot.lane.b32.xlu1 %v3120_v63, %s3287_s16  ;;  %v3122_v3 = vpop.eup %3121 }
0x1151   :  { %v1871_v5 = vadd.f32 1.0, %v3122_v3  ;;  %v3124_v6 = vpop.eup %3123 }
0x1152   :  { %v2043_v2 = vadd.f32 1.0, %v3124_v6 }
0x1153   :  { %3125 = vrcp.f32 %v1871_v5 }
0x1154   :  { %3127 = vrcp.f32 %v2043_v2 }
0x1160   :  { %v3126_v51 = vpop.eup %3125 }
0x1161   :  { %v3128_v8 = vpop.eup %3127  ;;  %v1875_v12 = vmul.f32 %v3126_v51, %v3722_v39 }
0x1162   :  { %v2047_v15 = vmul.f32 %v3128_v8, %v3724_v41 }
0x11bd   :  { %v1878_v4 = vpop.permute.xlu0 %1877 }
0x11be   :  { %v1880_v7 = vmul.f32 %v3126_v51, %v1878_v4 }
0x11c0   :  { %1882 = vrot.lane.b32.xlu0 %v1880_v7, %s3288_s17 }
0x11c2   :  { %v2050_v9 = vpop.permute.xlu1 %2049 }
0x11c3   :  { %v2052_v11 = vmul.f32 %v3128_v8, %v2050_v9 }
0x11c5   :  { %2054 = vrot.lane.b32.xlu1 %v2052_v11, %s3288_s17 }
0x1232   :  { %v1883_v13 = vpop.permute.xlu0 %1882 }
0x1233   :  { %v3798_v14 = vadd.f32 %v1883_v13, %v1875_v12 }
0x1235   :  { %3129 = vtanh.f32 %v3798_v14 }
0x1237   :  { %v2055_v16 = vpop.permute.xlu1 %2054 }
0x1238   :  { %v3802_v17 = vadd.f32 %v2055_v16, %v2047_v15 }
0x123a   :  { %3131 = vtanh.f32 %v3802_v17 }
0x1242   :  { %v3130_v18 = vpop.eup %3129 }
0x1243   :  { %1888 = vrot.lane.b32.xlu0 %v3130_v18, %s3287_s16 }
0x1247   :  { %v3132_v20 = vpop.eup %3131 }
0x1248   :  { %2060 = vrot.lane.b32.xlu1 %v3132_v20, %s3287_s16 }
0x12b5   :  { %v1889_v21 = vpop.permute.xlu0 %1888 }
0x12b6   :  { %v1891_v10 = vmul.f32 %v3126_v51, %v1889_v21 }
0x12b8   :  { %1963 = vrot.lane.b32.xlu0 %v1891_v10, %s3288_s17 }
0x12ba   :  { %v2061_v48 = vpop.permute.xlu1 %2060 }
0x12bb   :  { %v2063_v22 = vmul.f32 %v3128_v8, %v2061_v48 }
0x12bd   :  { %2065 = vrot.lane.b32.xlu1 %v2063_v22, %s3288_s17 }
0x132a   :  { %v1964_v23 = vpop.permute.xlu0 %1963 }
0x132b   :  { %2961 = vmatmul.mubr.msk.f32.vlgmr.msra.gmra.mxu1 %vm262_vm2, %v1964_v23 }
0x132c   :  { %2975 = vmatpush3.msra.mxu1 %v3737_v55  ;;  %2982 = vmatprep.mubr.msk.f32.mxu1 %vm3286_vm0, %v3285_v0 }
0x132d   :  { %2976 = vmatprep.subr.mxu1 %v3285_v0 }
0x132e   :  { %2977 = vmatpush3.msra.mxu1 %v3746_v56 }
0x132f   :  { %2978 = vmatprep.subr.mxu1 %v3285_v0  ;;  %v2066_v19 = vpop.permute.xlu1 %2065 }
0x1330   :  { %2979 = vmatpush3.msra.mxu1 %v3755_v57  ;;  %2972 = vmatmul.mubr.msk.f32.vlgmr.msra.gmra.mxu0 %vm262_vm2, %v2066_v19 }
0x1331   :  { %2980 = vmatprep.subr.mxu1 %v3285_v0  ;;  %2986 = vmatpush3.msra.mxu0 %v3162_v24  ;;  %v2440_v24 = vld [vmem:[%s3886_s7 + $0x18] sm:$0xff] }
0x1332   :  { %2981 = vmatpush3.msra.mxu1 %v3764_v28  ;;  %2987 = vmatprep.subr.mxu0 %v3285_v0 }
0x1333   :  { %2983 = vmatmul.mubr.msk.f32.vlgmr.msra.gmra.mxu1 %vm262_vm2, %v2066_v19  ;;  %2996 = vmatprep.subr.mxu1 %v3285_v0 }
0x1334   :  { %2997 = vmatpush3.msra.mxu1 %v3163_v27  ;;  %2988 = vmatpush3.msra.mxu0 %v3164_v29  ;;  %v2439_v27 = vld [vmem:[%s3886_s7 + $0x10] sm:$0xff]  ;;  %v2438_v29 = vld [vmem:[%s3886_s7 + $0x8] sm:$0xff] }
0x1335   :  { %2998 = vmatprep.subr.mxu1 %v3285_v0  ;;  %2989 = vmatprep.subr.mxu0 %v3285_v0 }
0x1336   :  { %2999 = vmatpush3.msra.mxu1 %v3165_v25  ;;  %2990 = vmatpush3.msra.mxu0 %v3166_v32  ;;  %v2437_v25 = vld [vmem:[%s3886_s7] sm:$0xff]  ;;  %s3289_s7 = smov [#allocation11]  }
0x1337   :  { %3000 = vmatprep.subr.mxu1 %v3285_v0  ;;  %2991 = vmatprep.subr.mxu0 %v3285_v0  ;;  %s2531_s14 = sshll.u32 %s3289_s7, 4  ;;  %s2532_s14 = int_to_ptr.vmem [resolvable:$true] %s2531_s14 }
0x1338   :  { %3001 = vmatpush3.msra.mxu1 %v3167_v34  ;;  %3004 = vmatprep.mubr.msk.f32.mxu1 %vm3286_vm0, %v3285_v0  ;;  %s3251_s15 = scalar_lea.vmem %s2532_s14, 128  ;;  %p3256_p7 = scmp.lt.s32.totalorder %s2532_s14, %s2532_s14 }
0x1339   :  { %3002 = vmatprep.subr.mxu1 %v3285_v0  ;;  %2992 = vmatpush3.msra.mxu0 %v3168_v37  ;;  %p3252_p6 = scmp.ne.s32.totalorder %s2532_s14, %s3251_s15  ;;  %p3257_p8 = scmp.lt.s32.totalorder %s3251_s15, %s3251_s15 }
0x133a   :  { %3003 = vmatpush3.msra.mxu1 %v3169_v38  ;;  %2993 = vmatprep.mubr.msk.f32.mxu0 %vm3286_vm0, %v3285_v0 }
0x133b   :  { %3007 = vmatprep.subr.mxu0 %v3285_v0  ;;  %p3258_p9 = por %p3257_p8, %p3256_p7 }
0x133d   :  { %p3259_p10 = pnand %p3258_p9, %p3252_p6 }
0x13eb   :  { %v2033_v39 = vpop.f32.mrf.mxu1 }
0x13ed   :  { %v2962_v41 = vpop.f32.mrf.mxu1 }
0x13ee   :  { %v2590_v41 = vld [vmem:[%s3887_s8] ss:$0 sm:$0xff] }
0x13f0   :  { %v2135_v42 = vpop.f32.mrf.mxu0 }
0x13f1   :  { %v2136_v43 = vadd.f32 %v2135_v42, %v2033_v39 }
0x13f2   :  { %v2973_v44 = vpop.f32.mrf.mxu0 }
0x13f3   :  { %v2139_v45 = vadd.f32 %v3506_v53, %v2136_v43  ;;  %v2230_v52 = vpop.f32.mrf.mxu1 }
0x13f4   :  { %v2311_v46 = vadd.f32 %v2230_v52, %v232_v49 }
0x13f5   :  { %3133 = vtanh.f32 %v2139_v45  ;;  %v2984_v54 = vpop.f32.mrf.mxu1  ;;  %v2584_v57 = vmul.f32 -1.442695, %v2139_v45 }
0x13f6   :  { %3135 = vtanh.f32 %v2311_v46  ;;  %v2587_v28 = vmul.f32 -1.442695, %v2311_v46 }
0x13f7   :  { %3137 = vpow2.f32 %v2584_v57 }
0x13f8   :  { %3139 = vpow2.f32 %v2587_v28 }
0x1402   :  { %v3134_v55 = vpop.eup %3133 }
0x1403   :  { %v3136_v56 = vpop.eup %3135  ;;  %2149 = vrot.lane.b32.xlu0 %v3134_v55, %s3287_s16 }
0x1404   :  { %2321 = vrot.lane.b32.xlu1 %v3136_v56, %s3287_s16  ;;  %v3138_v26 = vpop.eup %3137 }
0x1405   :  { %v3140_v50 = vpop.eup %3139  ;;  %v2143_v30 = vadd.f32 1.0, %v3138_v26 }
0x1406   :  { %v2315_v33 = vadd.f32 1.0, %v3140_v50 }
0x1407   :  { %3141 = vrcp.f32 %v2143_v30 }
0x1408   :  { %3143 = vrcp.f32 %v2315_v33 }
0x1414   :  { %v3142_v53 = vpop.eup %3141 }
0x1415   :  { %v3144_v58 = vpop.eup %3143  ;;  %v2147_v60 = vmul.f32 %v3142_v53, %v3798_v14  ;;  %v3170_v14 = vld [vmem:[%s3885_s6] ss:$0 sm:$0xff] }
0x1416   :  { %v2319_v40 = vmul.f32 %v3144_v58, %v3802_v17 }
0x1475   :  { %v2150_v35 = vpop.permute.xlu0 %2149 }
0x1476   :  { %v2322_v31 = vpop.permute.xlu1 %2321  ;;  %v2152_v59 = vmul.f32 %v3142_v53, %v2150_v35 }
0x1477   :  { %v2324_v36 = vmul.f32 %v3144_v58, %v2322_v31 }
0x1478   :  { %2154 = vrot.lane.b32.xlu0 %v2152_v59, %s3288_s17 }
0x1479   :  { %2326 = vrot.lane.b32.xlu1 %v2324_v36, %s3288_s17 }
0x14ea   :  { %v2155_v61 = vpop.permute.xlu0 %2154 }
0x14eb   :  { %v2327_v62 = vpop.permute.xlu1 %2326  ;;  %v2157_v63 = vadd.f32 %v2155_v61, %v2147_v60 }
0x14ec   :  { %v2329_v47 = vadd.f32 %v2327_v62, %v2319_v40 }
0x14ed   :  { %3145 = vtanh.f32 %v2157_v63 }
0x14ee   :  { %3147 = vtanh.f32 %v2329_v47 }
0x14fa   :  { %v3146_v1 = vpop.eup %3145 }
0x14fb   :  { %v3148_v3 = vpop.eup %3147  ;;  %2160 = vrot.lane.b32.xlu0 %v3146_v1, %s3287_s16 }
0x14fc   :  { %2332 = vrot.lane.b32.xlu1 %v3148_v3, %s3287_s16 }
0x156d   :  { %v2161_v5 = vpop.permute.xlu0 %2160 }
0x156e   :  { %v2333_v6 = vpop.permute.xlu1 %2332  ;;  %v2163_v2 = vmul.f32 %v3142_v53, %v2161_v5 }
0x156f   :  { %v2335_v51 = vmul.f32 %v3144_v58, %v2333_v6 }
0x1570   :  { %2235 = vrot.lane.b32.xlu0 %v2163_v2, %s3288_s17 }
0x1571   :  { %2337 = vrot.lane.b32.xlu1 %v2335_v51, %s3288_s17 }
0x15e2   :  { %v2236_v4 = vpop.permute.xlu0 %2235 }
0x15e3   :  { %v2338_v7 = vpop.permute.xlu1 %2337  ;;  %2994 = vmatmul.mubr.msk.f32.vlgmr.msra.gmra.mxu0 %vm262_vm2, %v2236_v4 }
0x15e4   :  { %3005 = vmatmul.mubr.msk.f32.vlgmr.msra.gmra.mxu1 %vm262_vm2, %v2338_v7  ;;  %3015 = vmatprep.mubr.msk.f32.mxu0 %vm3286_vm0, %v3285_v0 }
0x15e5   :  { %3008 = vmatpush3.msra.mxu0 %v2440_v24 }
0x15e6   :  { %3009 = vmatprep.subr.mxu0 %v3285_v0 }
0x15e7   :  { %3010 = vmatpush3.msra.mxu0 %v2439_v27 }
0x15e8   :  { %3011 = vmatprep.subr.mxu0 %v3285_v0 }
0x15e9   :  { %3012 = vmatpush3.msra.mxu0 %v2438_v29 }
0x15ea   :  { %3013 = vmatprep.subr.mxu0 %v3285_v0 }
0x15eb   :  { %3014 = vmatpush3.msra.mxu0 %v2437_v25 }
0x16a3   :  { %v2305_v8 = vpop.f32.mrf.mxu0 }
0x16a4   :  { %v2407_v9 = vpop.f32.mrf.mxu1 }
0x16a5   :  { %v2408_v11 = vadd.f32 %v2407_v9, %v2305_v8  ;;  %v2995_v12 = vpop.f32.mrf.mxu0 }
0x16a6   :  { %v3006_v13 = vpop.f32.mrf.mxu1 }
0x16a7   :  { %v2411_v15 = vadd.f32 %v3170_v14, %v2408_v11 }
0x16a9   :  { %3149 = vtanh.f32 %v2411_v15  ;;  %v2589_v17 = vmul.f32 -1.442695, %v2411_v15 }
0x16ab   :  { %3151 = vpow2.f32 %v2589_v17 }
0x16b6   :  { %v3150_v16 = vpop.eup %3149 }
0x16b7   :  { %2421 = vrot.lane.b32.xlu0 %v3150_v16, %s3287_s16 }
0x16b8   :  { %v3152_v18 = vpop.eup %3151 }
0x16b9   :  { %v2415_v20 = vadd.f32 1.0, %v3152_v18 }
0x16bb   :  { %3153 = vrcp.f32 %v2415_v20 }
0x16c8   :  { %v3154_v21 = vpop.eup %3153 }
0x16c9   :  { %v2419_v22 = vmul.f32 %v3154_v21, %v2157_v63 }
0x1729   :  { %v2422_v10 = vpop.permute.xlu0 %2421 }
0x172a   :  { %v2424_v48 = vmul.f32 %v3154_v21, %v2422_v10 }
0x172c   :  { %2426 = vrot.lane.b32.xlu1 %v2424_v48, %s3288_s17 }
0x179e   :  { %v2427_v23 = vpop.permute.xlu1 %2426 }
0x179f   :  { %v2429_v19 = vadd.f32 %v2427_v23, %v2419_v22 }
0x17a1   :  { %3155 = vtanh.f32 %v2429_v19 }
0x17ae   :  { %v3156_v32 = vpop.eup %3155 }
0x17af   :  { %2432 = vrot.lane.b32.xlu0 %v3156_v32, %s3287_s16 }
0x1821   :  { %v2433_v34 = vpop.permute.xlu0 %2432 }
0x1822   :  { %v2435_v37 = vmul.f32 %v3154_v21, %v2433_v34 }
0x1824   :  { %v2436_v38 = vmax.f32 %v2435_v37, 0.0 }
0x1826   :  { %2449 = vrot.lane.b32.xlu1 %v2436_v38, %s3288_s17 }
0x1898   :  { %v2450_v39 = vpop.permute.xlu1 %2449 }
0x1899   :  { %3016 = vmatmul.mubr.msk.f32.vlgmr.msra.gmra.mxu0 %vm262_vm2, %v2450_v39 }
0x1959   :  { %v2519_v42 = vpop.f32.mrf.mxu0 }
0x195a   :  { %v2520_v0 = vadd.f32 %v2590_v41, %v2519_v42 }
0x195b   :  { %v3017_v43 = vpop.f32.mrf.mxu0 }
0x195c   :  { %2524 = vst.msk [vmem:[#allocation11] sm:$0xff] %vm2523_vm3, %v2520_v0 }
0x195d   :  { %3262 = shalt.err (!%p3259_p10)
}
0x195e   :  { %2534 = dma.vmem_to_hbm [thread:$0]  %s2532_s14, 128, %s3888_s9, [#allocation5]  }
0x195f   :  { %3277 = dma.done.wait [#allocation5], 128  }
0x1960   :  { %3278 = vsyncadd [#allocation5], 4294967168 }
0x1961   :  { %2538 = vsyncpa [#allocation4], 1 }
0x1962   :  { %2539 = vsyncpa [#allocation7], 1 }
0x1963   :  { %2540 = vsyncpa [#allocation10], 1 }
0x1964   :  { %2541 = vsyncpa [#allocation5], 1 }

</bundles_post_ra>
